<compile_context>
chip_gen: v7x
topology: tpu7x:2x2x1
jax: 0.10.0
libtpu: 0.0.40
codegen_flags: <defaults>
</compile_context>

<pallas_src>
import functools

import jax
import jax.numpy as jnp
from jax.experimental import pallas as pl
from jax.experimental.pallas import tpu as pltpu


# ----------------------------------------------------------------------------
# helpers
# ----------------------------------------------------------------------------
_VMEM_LIMIT = 32 * 1024 * 1024  # safe on v5e/v6e (128 MiB) and v7x (64 MiB) per TC


def _pick_row_tile(m, cap=256):
    """Largest power-of-two row tile (>=8) dividing m, capped; else the full m."""
    t = cap
    while t >= 8:
        if m % t == 0:
            return t
        t //= 2
    return m


# ----------------------------------------------------------------------------
# Kernel 1: row-tiled matmul + bias (nn.Linear, fused projections, AvgPooling, head)
# ----------------------------------------------------------------------------
def _linear_kernel(x_ref, w_ref, b_ref, o_ref):
    o_ref[...] = (
        jnp.dot(x_ref[...], w_ref[...], preferred_element_type=jnp.float32)
        + b_ref[...]
    )


def pallas_linear(x, w_t, b=None, row_cap=256):
    """y = x @ w_t + b   with w_t pre-transposed to (in, out)."""
    M, K = x.shape
    Kw, Nout = w_t.shape
    assert K == Kw
    if b is None:
        b = jnp.zeros((1, Nout), jnp.float32)
    else:
        b = b.reshape(1, Nout).astype(jnp.float32)
    tm = _pick_row_tile(M, row_cap)
    return pl.pallas_call(
        _linear_kernel,
        out_shape=jax.ShapeDtypeStruct((M, Nout), jnp.float32),
        grid=(M // tm,),
        in_specs=[
            pl.BlockSpec((tm, K), lambda i: (i, 0)),
            pl.BlockSpec((K, Nout), lambda i: (0, 0)),
            pl.BlockSpec((1, Nout), lambda i: (0, 0)),
        ],
        out_specs=pl.BlockSpec((tm, Nout), lambda i: (i, 0)),
        compiler_params=pltpu.CompilerParams(
            dimension_semantics=("parallel",),
            vmem_limit_bytes=_VMEM_LIMIT,
        ),
    )(x.astype(jnp.float32), w_t.astype(jnp.float32), b)


# ----------------------------------------------------------------------------
# Kernel 2: fused EdgeGATConv layer + BatchNorm1d
#   grid over edge blocks (reduction axis); per-node accumulators live in VMEM
#   scratch; finalize (softmax divide, residual, bias, SiLU, BatchNorm) happens
#   at the last grid step with the full (N, H*F) result resident.
# ----------------------------------------------------------------------------
def _gat_bn_kernel(el_ref, er_ref, cmax_ref, fs_ref, res_ref, bias_ref,
                   expand_ref, fold_ref, foldt_ref, gamma_ref, beta_ref,
                   ee_ref, fe_ref, s_ref, d_ref,
                   o_ref, num_acc, den_acc, *, n_heads, eps):
    k = pl.program_id(0)

    @pl.when(k == 0)
    def _init():
        num_acc[...] = jnp.zeros_like(num_acc)
        den_acc[...] = jnp.zeros_like(den_acc)

    bf16 = jnp.bfloat16
    f32 = jnp.float32

    def mm(a, b):       # a @ b, f32 accumulation on the MXU
        return jax.lax.dot_general(a, b, (((1,), (0,)), ((), ())),
                                   preferred_element_type=f32)

    def mm_t(a, b):     # a.T @ b (contract edge axis) -- no DT materialization
        return jax.lax.dot_general(a, b, (((0,), (0,)), ((), ())),
                                   preferred_element_type=f32)

    S = s_ref[...]                       # (TE, N)  bf16 one-hot of edge source
    D = d_ref[...]                       # (TE, N)  bf16 one-hot of edge destination
    el = el_ref[...].astype(bf16)        # (N, H)
    er = er_ref[...].astype(bf16)        # (N, H)
    fs = fs_ref[...].astype(bf16)        # (N, H*F)  W_h h
    fe = fe_ref[...]                     # (TE, H*F) W_e f (this edge block)

    # per-edge attention logits for this block of edges
    e = mm(S, el) + mm(D, er) + ee_ref[...]          # (TE, H)
    e = jnp.where(e >= 0.0, e, 0.2 * e)              # LeakyReLU(negative_slope=0.2)
    # subtract a global per-head upper bound of the post-LeakyReLU logits:
    # exp <= 1 (no overflow), and the constant cancels exactly in the softmax ratio.
    pe = jnp.exp(e - cmax_ref[...])                  # (TE, H)

    # broadcast the per-head weight over that head's F features (tiny MXU copy)
    pe_f = mm(pe, expand_ref[...])                   # (TE, H*F)
    msg = (mm(S, fs) + fe) * pe_f                    # (TE, H*F)

    # scatter-add over destination nodes: D^T @ (.)
    num_acc[...] += mm_t(D, msg.astype(bf16))        # (N, H*F)
    den_acc[...] += mm_t(D, pe.astype(bf16))         # (N, H)

    @pl.when(k == pl.num_programs(0) - 1)
    def _finalize():
        den_f = mm(den_acc[...], expand_ref[...])                     # (N, H*F)
        rst = num_acc[...] * pl.reciprocal(den_f + 1e-9, approx=True)
        rst = rst + res_ref[...] + bias_ref[...]                      # residual + bias
        rst = rst * (1.0 / (1.0 + jnp.exp(-rst)))                     # SiLU

        # BatchNorm1d(F) in training mode over the (N*H, F) view
        # (== permute(0,2,1) -> BN(hidden) -> permute back in the PyTorch module)
        cnt = float(rst.shape[0] * n_heads)
        s1 = mm(jnp.sum(rst, axis=0, keepdims=True), fold_ref[...])          # (1, F)
        s2 = mm(jnp.sum(rst * rst, axis=0, keepdims=True), fold_ref[...])    # (1, F)
        mean = s1 / cnt
        var = s2 / cnt - mean * mean                                         # biased var
        scale = jax.lax.rsqrt(var + eps) * gamma_ref[...]                    # (1, F)
        shift = beta_ref[...] - mean * scale                                 # (1, F)
        o_ref[...] = rst * mm(scale, foldt_ref[...]) + mm(shift, foldt_ref[...])


def pallas_edge_gat_bn(el, er, cmax, fs, res, gat_bias,
                       expand, fold, fold_t, gamma, beta,
                       ee, fe, S_bf, D_bf, H, F, e_tile_cap=256, eps=1e-5):
    N, HF = fs.shape
    E = S_bf.shape[0]
    te = _pick_row_tile(E, e_tile_cap)
    bias = gat_bias.reshape(1, HF).astype(jnp.float32)
    gamma = gamma.reshape(1, F).astype(jnp.float32)
    beta = beta.reshape(1, F).astype(jnp.float32)

    full = lambda shape: pl.BlockSpec(shape, lambda k: (0, 0))
    blk = lambda rows, cols: pl.BlockSpec((rows, cols), lambda k: (k, 0))

    kernel = functools.partial(_gat_bn_kernel, n_heads=H, eps=eps)
    return pl.pallas_call(
        kernel,
        out_shape=jax.ShapeDtypeStruct((N, HF), jnp.float32),
        grid=(E // te,),
        in_specs=[
            full((N, H)),       # el
            full((N, H)),       # er
            full((1, H)),       # cmax
            full((N, HF)),      # fs
            full((N, HF)),      # res
            full((1, HF)),      # bias
            full((H, HF)),      # expand (per-head -> per-column broadcast)
            full((HF, F)),      # fold   (sum head groups -> per-feature)
            full((F, HF)),      # fold^T (per-feature -> per-column broadcast)
            full((1, F)),       # bn gamma
            full((1, F)),       # bn beta
            blk(te, H),         # ee  (edge block)
            blk(te, HF),        # fe  (edge block)
            blk(te, N),         # S   (edge block)
            blk(te, N),         # D   (edge block)
        ],
        out_specs=full((N, HF)),
        scratch_shapes=[pltpu.VMEM((N, HF), jnp.float32),
                        pltpu.VMEM((N, H), jnp.float32)],
        compiler_params=pltpu.CompilerParams(
            dimension_semantics=("arbitrary",),
            vmem_limit_bytes=_VMEM_LIMIT,
        ),
    )(el, er, cmax, fs, res, bias, expand, fold, fold_t, gamma, beta,
      ee, fe, S_bf, D_bf)


# ----------------------------------------------------------------------------
# Parameter / structural-matrix construction (plain JAX glue, done once)
# ----------------------------------------------------------------------------
def block_attn_matrix(a, H, F):
    """attn vector (H, F) -> block-diagonal (H*F, H) so fs @ A == per-head dot."""
    m = jnp.zeros((H * F, H), jnp.float32)
    for h in range(H):
        m = m.at[h * F:(h + 1) * F, h].set(a[h])
    return m


def make_head_maps(H, F):
    heads = jnp.arange(H)
    feats = jnp.arange(F)
    col_head = jnp.repeat(heads, F)                                     # (H*F,)
    col_feat = jnp.tile(feats, H)                                       # (H*F,)
    expand = (col_head[None, :] == heads[:, None]).astype(jnp.float32)  # (H, H*F)
    fold = (col_feat[:, None] == feats[None, :]).astype(jnp.float32)    # (H*F, F)
    return expand, fold, fold.T


def init_params(key, node_dim, edge_dim, hidden, num_layers, H):
    F = hidden

    def nrm(k, shape, scale=0.1):
        return scale * jax.random.normal(k, shape, dtype=jnp.float32)

    keys = jax.random.split(key, 6 + num_layers)
    params = {
        # all Linear weights are stored pre-transposed: (in, out)
        "node_proj_wt": nrm(keys[0], (node_dim, hidden)),
        "node_proj_b": nrm(keys[1], (hidden,)),
        "edge_proj_wt": nrm(keys[2], (edge_dim, hidden)),
        "edge_proj_b": nrm(keys[3], (hidden,)),
        "head_wt": nrm(keys[4], (H * hidden, hidden)),
        "head_b": nrm(keys[5], (hidden,)),
        "layers": [],
    }
    for l in range(num_layers):
        lk = jax.random.split(keys[6 + l], 7)
        fc_wt = nrm(lk[0], (hidden, H * F))        # W_h^T  (no bias)
        fc_edge_wt = nrm(lk[1], (hidden, H * F))   # W_e^T  (no bias)
        attn_l = nrm(lk[2], (H, F))
        attn_r = nrm(lk[3], (H, F))
        attn_e = nrm(lk[4], (H, F))
        res_fc_wt = nrm(lk[5], (hidden, H * F))    # residual projection (no bias)
        A_l = block_attn_matrix(attn_l, H, F)
        A_r = block_attn_matrix(attn_r, H, F)
        A_e = block_attn_matrix(attn_e, H, F)
        # fuse W_h, res_fc and the attention projections into single matmuls:
        #   el = (nodes @ W_h^T) @ A_l == nodes @ (W_h^T @ A_l)
        w_node_fused = jnp.concatenate(
            [fc_wt, res_fc_wt, fc_wt @ A_l, fc_wt @ A_r], axis=1)   # (hidden, 2HF+2H)
        w_edge_fused = jnp.concatenate(
            [fc_edge_wt, fc_edge_wt @ A_e], axis=1)                 # (hidden, HF+H)
        params["layers"].append({
            "w_node_fused": w_node_fused,
            "w_edge_fused": w_edge_fused,
            "gat_bias": nrm(lk[6], (H * F,)),
            "bn_gamma": jnp.ones((F,), jnp.float32),   # PyTorch BN defaults
            "bn_beta": jnp.zeros((F,), jnp.float32),
        })
    return params


# ----------------------------------------------------------------------------
# Full forward pass of GraphEncoderWithNodes
# ----------------------------------------------------------------------------
def graph_encoder_forward(params, node_feat, edge_feat, S_bf, D_bf, P, nodes_idx,
                          H, hidden):
    F = hidden
    HF = H * F

    nodes = pallas_linear(node_feat, params["node_proj_wt"], params["node_proj_b"])
    edges = pallas_linear(edge_feat, params["edge_proj_wt"], params["edge_proj_b"])
    # NOTE: self.actiovation (SiLU) is defined but never used in the reference forward.

    expand, fold, fold_t = make_head_maps(H, F)

    x = None
    for lyr in params["layers"]:
        np_out = pallas_linear(nodes, lyr["w_node_fused"])    # (N, 2HF+2H)
        ep_out = pallas_linear(edges, lyr["w_edge_fused"])    # (E, HF+H)
        fs = np_out[:, :HF]                 # W_h h
        res = np_out[:, HF:2 * HF]          # residual projection
        el = np_out[:, 2 * HF:2 * HF + H]   # per-head left attention logits
        er = np_out[:, 2 * HF + H:]         # per-head right attention logits
        fe = ep_out[:, :HF]                 # W_e f
        ee = ep_out[:, HF:]                 # per-head edge attention logits

        # global per-head upper bound of the post-LeakyReLU logits (tiny glue);
        # subtracting it is exact for the softmax ratio and prevents exp overflow.
        c = jnp.max(el, axis=0) + jnp.max(er, axis=0) + jnp.max(ee, axis=0)
        c = jnp.where(c >= 0.0, c, 0.2 * c).reshape(1, H).astype(jnp.float32)

        x = pallas_edge_gat_bn(el, er, c, fs, res, lyr["gat_bias"],
                               expand, fold, fold_t,
                               lyr["bn_gamma"], lyr["bn_beta"],
                               ee, fe, S_bf, D_bf, H, F)      # (N, H*F)
        # NOTE: as in the reference code, `nodes`/`edges` are NOT updated between
        # layers; each layer reads the initial projections.

    # head Linear commutes with averaging -> apply after pooling / row gather
    pooled_raw = pallas_linear(P, x)                  # AvgPooling -> (B, H*F)
    sel = x[nodes_idx]                                # row gather: JAX glue
    both = jnp.concatenate([pooled_raw, sel], axis=0)
    head_out = pallas_linear(both, params["head_wt"], params["head_b"])
    B = P.shape[0]
    return head_out[:B], head_out[B:]


# ----------------------------------------------------------------------------
# Example run
# ----------------------------------------------------------------------------
if __name__ == "__main__":
    node_dim, edge_dim, hidden, num_layers, H = 6, 5, 32, 2, 4

    key = jax.random.PRNGKey(0)
    k_param, k_node, k_edge = jax.random.split(key, 3)

    # Batched graph: graph0 = nodes 0..9 (10 nodes), graph1 = nodes 10..15 (6 nodes).
    # Bidirectional rings + chord edges so every node has in-degree >= 1.
    def ring_edges(lo, n):
        s, d = [], []
        for i in range(n):
            s += [lo + i, lo + (i + 1) % n]
            d += [lo + (i + 1) % n, lo + i]
        return s, d

    s0, d0 = ring_edges(0, 10)
    s1, d1 = ring_edges(10, 6)
    s0 += [i for i in range(10)]
    d0 += [(i + 3) % 10 for i in range(10)]
    s1 += [10 + i for i in range(6)]
    d1 += [10 + (i + 2) % 6 for i in range(6)]
    src = jnp.array(s0 + s1, jnp.int32)
    dst = jnp.array(d0 + d1, jnp.int32)
    node_graph = jnp.array([0] * 10 + [1] * 6, jnp.int32)
    N, E, B = 16, int(src.shape[0]), 2          # E = 48 -> edge grid of 3 blocks

    node_feat = jax.random.normal(k_node, (N, node_dim), dtype=jnp.float32)
    edge_feat = jax.random.normal(k_edge, (E, edge_dim), dtype=jnp.float32)
    nodes_idx = jnp.array([0, 10], jnp.int32)

    # Dense incidence / pooling matrices (graph structure as matmuls).
    # S, D are exact 0/1 -> bf16 is lossless and halves their HBM/VMEM footprint.
    S_bf = jax.nn.one_hot(src, N, dtype=jnp.bfloat16)   # (E, N) edge <- source node
    D_bf = jax.nn.one_hot(dst, N, dtype=jnp.bfloat16)   # (E, N) edge <- destination node
    Pm = jax.nn.one_hot(node_graph, B, dtype=jnp.float32).T   # (B, N)
    Pm = Pm / jnp.sum(Pm, axis=1, keepdims=True)              # AvgPooling matrix

    params = init_params(k_param, node_dim, edge_dim, hidden, num_layers, H)

    fwd = jax.jit(functools.partial(graph_encoder_forward, H=H, hidden=hidden))
    pooled, node_out = fwd(params, node_feat, edge_feat, S_bf, D_bf, Pm, nodes_idx)

    jax.block_until_ready((pooled, node_out))
    assert pooled.shape == (B, hidden) and node_out.shape == (int(nodes_idx.shape[0]), hidden)
    assert bool(jnp.all(jnp.isfinite(pooled))) and bool(jnp.all(jnp.isfinite(node_out)))
    print("KERNEL_OK")
</pallas_src>

<mosaic_0001>
module attributes {stable_mosaic.version = 11 : i64} {
  func.func @_linear_kernel(%arg0: i32, %arg1: memref<16x32xf32, #tpu.memory_space<vmem>>, %arg2: memref<32x264xf32, #tpu.memory_space<vmem>>, %arg3: memref<1x264xf32, #tpu.memory_space<vmem>>, %arg4: memref<16x264xf32, #tpu.memory_space<vmem>>) attributes {dimension_semantics = [#tpu.dimension_semantics<parallel>], iteration_bounds = array<i64: 1>, scalar_prefetch = 0 : i64, scratch_operands = 0 : i64, tpu.core_type = #tpu.core_type<tc>, window_params = [{transform_indices = @transform_0, window_bounds = array<i64: 16, 32>}, {pipeline_mode = #tpu.pipeline_mode<synchronous>, transform_indices = @transform_1, window_bounds = array<i64: 32, 264>}, {pipeline_mode = #tpu.pipeline_mode<synchronous>, transform_indices = @transform_2, window_bounds = array<i64: 1, 264>}, {transform_indices = @transform_3, window_bounds = array<i64: 16, 264>}]} {
    %c0 = arith.constant 0 : index
    %c0_0 = arith.constant 0 : index
    %0 = vector.load %arg1[%c0, %c0_0] : memref<16x32xf32, #tpu.memory_space<vmem>>, vector<16x32xf32>
    %c0_1 = arith.constant 0 : index
    %c0_2 = arith.constant 0 : index
    %1 = vector.load %arg2[%c0_1, %c0_2] : memref<32x264xf32, #tpu.memory_space<vmem>>, vector<32x264xf32>
    %cst = arith.constant dense<0.000000e+00> : vector<16x264xf32>
    %2 = tpu.matmul %0, %1, %cst {dimension_numbers = #tpu.dot_dimension_numbers<[1], [0], [0], [1], [0, 0, 1, 1], [], []>} : vector<16x32xf32>, vector<32x264xf32>, vector<16x264xf32> -> vector<16x264xf32>
    %c0_3 = arith.constant 0 : index
    %c0_4 = arith.constant 0 : index
    %3 = vector.load %arg3[%c0_3, %c0_4] : memref<1x264xf32, #tpu.memory_space<vmem>>, vector<1x264xf32>
    %4 = vector.broadcast %3 : vector<1x264xf32> to vector<16x264xf32>
    %5 = arith.addf %2, %4 : vector<16x264xf32>
    %c0_5 = arith.constant 0 : index
    %c0_6 = arith.constant 0 : index
    %6 = vector.load %arg4[%c0_5, %c0_6] : memref<16x264xf32, #tpu.memory_space<vmem>>, vector<16x264xf32>
    tpu.vector_store %arg4[%c0_5, %c0_6], %5 {strides = array<i32>} : memref<16x264xf32, #tpu.memory_space<vmem>>, vector<16x264xf32>,
    return
  }
  func.func @transform_0(%arg0: i32) -> (i32, i32) {
    %c0_i32 = arith.constant 0 : i32
    %c0_i32_0 = arith.constant 0 : i32
    return %arg0, %c0_i32 : i32, i32
  }
  func.func @transform_1(%arg0: i32) -> (i32, i32) {
    %c0_i32 = arith.constant 0 : i32
    %c0_i32_0 = arith.constant 0 : i32
    %c0_i32_1 = arith.constant 0 : i32
    return %c0_i32, %c0_i32_0 : i32, i32
  }
  func.func @transform_2(%arg0: i32) -> (i32, i32) {
    %c0_i32 = arith.constant 0 : i32
    %c0_i32_0 = arith.constant 0 : i32
    %c0_i32_1 = arith.constant 0 : i32
    return %c0_i32, %c0_i32_0 : i32, i32
  }
  func.func @transform_3(%arg0: i32) -> (i32, i32) {
    %c0_i32 = arith.constant 0 : i32
    %c0_i32_0 = arith.constant 0 : i32
    return %arg0, %c0_i32 : i32, i32
  }
}

module attributes {stable_mosaic.version = 11 : i64} {
  func.func @_linear_kernel(%arg0: i32, %arg1: memref<16x6xf32, #tpu.memory_space<vmem>>, %arg2: memref<6x32xf32, #tpu.memory_space<vmem>>, %arg3: memref<1x32xf32, #tpu.memory_space<vmem>>, %arg4: memref<16x32xf32, #tpu.memory_space<vmem>>) attributes {dimension_semantics = [#tpu.dimension_semantics<parallel>], iteration_bounds = array<i64: 1>, scalar_prefetch = 0 : i64, scratch_operands = 0 : i64, tpu.core_type = #tpu.core_type<tc>, window_params = [{transform_indices = @transform_0, window_bounds = array<i64: 16, 6>}, {pipeline_mode = #tpu.pipeline_mode<synchronous>, transform_indices = @transform_1, window_bounds = array<i64: 6, 32>}, {pipeline_mode = #tpu.pipeline_mode<synchronous>, transform_indices = @transform_2, window_bounds = array<i64: 1, 32>}, {transform_indices = @transform_3, window_bounds = array<i64: 16, 32>}]} {
    %c0 = arith.constant 0 : index
    %c0_0 = arith.constant 0 : index
    %0 = vector.load %arg1[%c0, %c0_0] : memref<16x6xf32, #tpu.memory_space<vmem>>, vector<16x6xf32>
    %c0_1 = arith.constant 0 : index
    %c0_2 = arith.constant 0 : index
    %1 = vector.load %arg2[%c0_1, %c0_2] : memref<6x32xf32, #tpu.memory_space<vmem>>, vector<6x32xf32>
    %cst = arith.constant dense<0.000000e+00> : vector<16x32xf32>
    %2 = tpu.matmul %0, %1, %cst {dimension_numbers = #tpu.dot_dimension_numbers<[1], [0], [0], [1], [0, 0, 1, 1], [], []>} : vector<16x6xf32>, vector<6x32xf32>, vector<16x32xf32> -> vector<16x32xf32>
    %c0_3 = arith.constant 0 : index
    %c0_4 = arith.constant 0 : index
    %3 = vector.load %arg3[%c0_3, %c0_4] : memref<1x32xf32, #tpu.memory_space<vmem>>, vector<1x32xf32>
    %4 = vector.broadcast %3 : vector<1x32xf32> to vector<16x32xf32>
    %5 = arith.addf %2, %4 : vector<16x32xf32>
    %c0_5 = arith.constant 0 : index
    %c0_6 = arith.constant 0 : index
    %6 = vector.load %arg4[%c0_5, %c0_6] : memref<16x32xf32, #tpu.memory_space<vmem>>, vector<16x32xf32>
    tpu.vector_store %arg4[%c0_5, %c0_6], %5 {strides = array<i32>} : memref<16x32xf32, #tpu.memory_space<vmem>>, vector<16x32xf32>,
    return
  }
  func.func @transform_0(%arg0: i32) -> (i32, i32) {
    %c0_i32 = arith.constant 0 : i32
    %c0_i32_0 = arith.constant 0 : i32
    return %arg0, %c0_i32 : i32, i32
  }
  func.func @transform_1(%arg0: i32) -> (i32, i32) {
    %c0_i32 = arith.constant 0 : i32
    %c0_i32_0 = arith.constant 0 : i32
    %c0_i32_1 = arith.constant 0 : i32
    return %c0_i32, %c0_i32_0 : i32, i32
  }
  func.func @transform_2(%arg0: i32) -> (i32, i32) {
    %c0_i32 = arith.constant 0 : i32
    %c0_i32_0 = arith.constant 0 : i32
    %c0_i32_1 = arith.constant 0 : i32
    return %c0_i32, %c0_i32_0 : i32, i32
  }
  func.func @transform_3(%arg0: i32) -> (i32, i32) {
    %c0_i32 = arith.constant 0 : i32
    %c0_i32_0 = arith.constant 0 : i32
    return %arg0, %c0_i32 : i32, i32
  }
}

module attributes {stable_mosaic.version = 11 : i64} {
  func.func @_linear_kernel(%arg0: i32, %arg1: memref<16x5xf32, #tpu.memory_space<vmem>>, %arg2: memref<5x32xf32, #tpu.memory_space<vmem>>, %arg3: memref<1x32xf32, #tpu.memory_space<vmem>>, %arg4: memref<16x32xf32, #tpu.memory_space<vmem>>) attributes {dimension_semantics = [#tpu.dimension_semantics<parallel>], iteration_bounds = array<i64: 3>, scalar_prefetch = 0 : i64, scratch_operands = 0 : i64, tpu.core_type = #tpu.core_type<tc>, window_params = [{transform_indices = @transform_0, window_bounds = array<i64: 16, 5>}, {pipeline_mode = #tpu.pipeline_mode<synchronous>, transform_indices = @transform_1, window_bounds = array<i64: 5, 32>}, {pipeline_mode = #tpu.pipeline_mode<synchronous>, transform_indices = @transform_2, window_bounds = array<i64: 1, 32>}, {transform_indices = @transform_3, window_bounds = array<i64: 16, 32>}]} {
    %c0 = arith.constant 0 : index
    %c0_0 = arith.constant 0 : index
    %0 = vector.load %arg1[%c0, %c0_0] : memref<16x5xf32, #tpu.memory_space<vmem>>, vector<16x5xf32>
    %c0_1 = arith.constant 0 : index
    %c0_2 = arith.constant 0 : index
    %1 = vector.load %arg2[%c0_1, %c0_2] : memref<5x32xf32, #tpu.memory_space<vmem>>, vector<5x32xf32>
    %cst = arith.constant dense<0.000000e+00> : vector<16x32xf32>
    %2 = tpu.matmul %0, %1, %cst {dimension_numbers = #tpu.dot_dimension_numbers<[1], [0], [0], [1], [0, 0, 1, 1], [], []>} : vector<16x5xf32>, vector<5x32xf32>, vector<16x32xf32> -> vector<16x32xf32>
    %c0_3 = arith.constant 0 : index
    %c0_4 = arith.constant 0 : index
    %3 = vector.load %arg3[%c0_3, %c0_4] : memref<1x32xf32, #tpu.memory_space<vmem>>, vector<1x32xf32>
    %4 = vector.broadcast %3 : vector<1x32xf32> to vector<16x32xf32>
    %5 = arith.addf %2, %4 : vector<16x32xf32>
    %c0_5 = arith.constant 0 : index
    %c0_6 = arith.constant 0 : index
    %6 = vector.load %arg4[%c0_5, %c0_6] : memref<16x32xf32, #tpu.memory_space<vmem>>, vector<16x32xf32>
    tpu.vector_store %arg4[%c0_5, %c0_6], %5 {strides = array<i32>} : memref<16x32xf32, #tpu.memory_space<vmem>>, vector<16x32xf32>,
    return
  }
  func.func @transform_0(%arg0: i32) -> (i32, i32) {
    %c0_i32 = arith.constant 0 : i32
    %c0_i32_0 = arith.constant 0 : i32
    return %arg0, %c0_i32 : i32, i32
  }
  func.func @transform_1(%arg0: i32) -> (i32, i32) {
    %c0_i32 = arith.constant 0 : i32
    %c0_i32_0 = arith.constant 0 : i32
    %c0_i32_1 = arith.constant 0 : i32
    return %c0_i32, %c0_i32_0 : i32, i32
  }
  func.func @transform_2(%arg0: i32) -> (i32, i32) {
    %c0_i32 = arith.constant 0 : i32
    %c0_i32_0 = arith.constant 0 : i32
    %c0_i32_1 = arith.constant 0 : i32
    return %c0_i32, %c0_i32_0 : i32, i32
  }
  func.func @transform_3(%arg0: i32) -> (i32, i32) {
    %c0_i32 = arith.constant 0 : i32
    %c0_i32_0 = arith.constant 0 : i32
    return %arg0, %c0_i32 : i32, i32
  }
}

module attributes {stable_mosaic.version = 11 : i64} {
  func.func @_linear_kernel(%arg0: i32, %arg1: memref<16x32xf32, #tpu.memory_space<vmem>>, %arg2: memref<32x132xf32, #tpu.memory_space<vmem>>, %arg3: memref<1x132xf32, #tpu.memory_space<vmem>>, %arg4: memref<16x132xf32, #tpu.memory_space<vmem>>) attributes {dimension_semantics = [#tpu.dimension_semantics<parallel>], iteration_bounds = array<i64: 3>, scalar_prefetch = 0 : i64, scratch_operands = 0 : i64, tpu.core_type = #tpu.core_type<tc>, window_params = [{transform_indices = @transform_0, window_bounds = array<i64: 16, 32>}, {pipeline_mode = #tpu.pipeline_mode<synchronous>, transform_indices = @transform_1, window_bounds = array<i64: 32, 132>}, {pipeline_mode = #tpu.pipeline_mode<synchronous>, transform_indices = @transform_2, window_bounds = array<i64: 1, 132>}, {transform_indices = @transform_3, window_bounds = array<i64: 16, 132>}]} {
    %c0 = arith.constant 0 : index
    %c0_0 = arith.constant 0 : index
    %0 = vector.load %arg1[%c0, %c0_0] : memref<16x32xf32, #tpu.memory_space<vmem>>, vector<16x32xf32>
    %c0_1 = arith.constant 0 : index
    %c0_2 = arith.constant 0 : index
    %1 = vector.load %arg2[%c0_1, %c0_2] : memref<32x132xf32, #tpu.memory_space<vmem>>, vector<32x132xf32>
    %cst = arith.constant dense<0.000000e+00> : vector<16x132xf32>
    %2 = tpu.matmul %0, %1, %cst {dimension_numbers = #tpu.dot_dimension_numbers<[1], [0], [0], [1], [0, 0, 1, 1], [], []>} : vector<16x32xf32>, vector<32x132xf32>, vector<16x132xf32> -> vector<16x132xf32>
    %c0_3 = arith.constant 0 : index
    %c0_4 = arith.constant 0 : index
    %3 = vector.load %arg3[%c0_3, %c0_4] : memref<1x132xf32, #tpu.memory_space<vmem>>, vector<1x132xf32>
    %4 = vector.broadcast %3 : vector<1x132xf32> to vector<16x132xf32>
    %5 = arith.addf %2, %4 : vector<16x132xf32>
    %c0_5 = arith.constant 0 : index
    %c0_6 = arith.constant 0 : index
    %6 = vector.load %arg4[%c0_5, %c0_6] : memref<16x132xf32, #tpu.memory_space<vmem>>, vector<16x132xf32>
    tpu.vector_store %arg4[%c0_5, %c0_6], %5 {strides = array<i32>} : memref<16x132xf32, #tpu.memory_space<vmem>>, vector<16x132xf32>,
    return
  }
  func.func @transform_0(%arg0: i32) -> (i32, i32) {
    %c0_i32 = arith.constant 0 : i32
    %c0_i32_0 = arith.constant 0 : i32
    return %arg0, %c0_i32 : i32, i32
  }
  func.func @transform_1(%arg0: i32) -> (i32, i32) {
    %c0_i32 = arith.constant 0 : i32
    %c0_i32_0 = arith.constant 0 : i32
    %c0_i32_1 = arith.constant 0 : i32
    return %c0_i32, %c0_i32_0 : i32, i32
  }
  func.func @transform_2(%arg0: i32) -> (i32, i32) {
    %c0_i32 = arith.constant 0 : i32
    %c0_i32_0 = arith.constant 0 : i32
    %c0_i32_1 = arith.constant 0 : i32
    return %c0_i32, %c0_i32_0 : i32, i32
  }
  func.func @transform_3(%arg0: i32) -> (i32, i32) {
    %c0_i32 = arith.constant 0 : i32
    %c0_i32_0 = arith.constant 0 : i32
    return %arg0, %c0_i32 : i32, i32
  }
}

module attributes {stable_mosaic.version = 11 : i64} {
  func.func @_linear_kernel(%arg0: i32, %arg1: memref<2x16xf32, #tpu.memory_space<vmem>>, %arg2: memref<16x128xf32, #tpu.memory_space<vmem>>, %arg3: memref<1x128xf32, #tpu.memory_space<vmem>>, %arg4: memref<2x128xf32, #tpu.memory_space<vmem>>) attributes {dimension_semantics = [#tpu.dimension_semantics<parallel>], iteration_bounds = array<i64: 1>, scalar_prefetch = 0 : i64, scratch_operands = 0 : i64, tpu.core_type = #tpu.core_type<tc>, window_params = [{transform_indices = @transform_0, window_bounds = array<i64: 2, 16>}, {pipeline_mode = #tpu.pipeline_mode<synchronous>, transform_indices = @transform_1, window_bounds = array<i64: 16, 128>}, {pipeline_mode = #tpu.pipeline_mode<synchronous>, transform_indices = @transform_2, window_bounds = array<i64: 1, 128>}, {transform_indices = @transform_3, window_bounds = array<i64: 2, 128>}]} {
    %c0 = arith.constant 0 : index
    %c0_0 = arith.constant 0 : index
    %0 = vector.load %arg1[%c0, %c0_0] : memref<2x16xf32, #tpu.memory_space<vmem>>, vector<2x16xf32>
    %c0_1 = arith.constant 0 : index
    %c0_2 = arith.constant 0 : index
    %1 = vector.load %arg2[%c0_1, %c0_2] : memref<16x128xf32, #tpu.memory_space<vmem>>, vector<16x128xf32>
    %cst = arith.constant dense<0.000000e+00> : vector<2x128xf32>
    %2 = tpu.matmul %0, %1, %cst {dimension_numbers = #tpu.dot_dimension_numbers<[1], [0], [0], [1], [0, 0, 1, 1], [], []>} : vector<2x16xf32>, vector<16x128xf32>, vector<2x128xf32> -> vector<2x128xf32>
    %c0_3 = arith.constant 0 : index
    %c0_4 = arith.constant 0 : index
    %3 = vector.load %arg3[%c0_3, %c0_4] : memref<1x128xf32, #tpu.memory_space<vmem>>, vector<1x128xf32>
    %4 = vector.broadcast %3 : vector<1x128xf32> to vector<2x128xf32>
    %5 = arith.addf %2, %4 : vector<2x128xf32>
    %c0_5 = arith.constant 0 : index
    %c0_6 = arith.constant 0 : index
    %6 = vector.load %arg4[%c0_5, %c0_6] : memref<2x128xf32, #tpu.memory_space<vmem>>, vector<2x128xf32>
    tpu.vector_store %arg4[%c0_5, %c0_6], %5 {strides = array<i32>} : memref<2x128xf32, #tpu.memory_space<vmem>>, vector<2x128xf32>,
    return
  }
  func.func @transform_0(%arg0: i32) -> (i32, i32) {
    %c0_i32 = arith.constant 0 : i32
    %c0_i32_0 = arith.constant 0 : i32
    return %arg0, %c0_i32 : i32, i32
  }
  func.func @transform_1(%arg0: i32) -> (i32, i32) {
    %c0_i32 = arith.constant 0 : i32
    %c0_i32_0 = arith.constant 0 : i32
    %c0_i32_1 = arith.constant 0 : i32
    return %c0_i32, %c0_i32_0 : i32, i32
  }
  func.func @transform_2(%arg0: i32) -> (i32, i32) {
    %c0_i32 = arith.constant 0 : i32
    %c0_i32_0 = arith.constant 0 : i32
    %c0_i32_1 = arith.constant 0 : i32
    return %c0_i32, %c0_i32_0 : i32, i32
  }
  func.func @transform_3(%arg0: i32) -> (i32, i32) {
    %c0_i32 = arith.constant 0 : i32
    %c0_i32_0 = arith.constant 0 : i32
    return %arg0, %c0_i32 : i32, i32
  }
}

module attributes {stable_mosaic.version = 11 : i64} {
  func.func @_linear_kernel(%arg0: i32, %arg1: memref<4x128xf32, #tpu.memory_space<vmem>>, %arg2: memref<128x32xf32, #tpu.memory_space<vmem>>, %arg3: memref<1x32xf32, #tpu.memory_space<vmem>>, %arg4: memref<4x32xf32, #tpu.memory_space<vmem>>) attributes {dimension_semantics = [#tpu.dimension_semantics<parallel>], iteration_bounds = array<i64: 1>, scalar_prefetch = 0 : i64, scratch_operands = 0 : i64, tpu.core_type = #tpu.core_type<tc>, window_params = [{transform_indices = @transform_0, window_bounds = array<i64: 4, 128>}, {pipeline_mode = #tpu.pipeline_mode<synchronous>, transform_indices = @transform_1, window_bounds = array<i64: 128, 32>}, {pipeline_mode = #tpu.pipeline_mode<synchronous>, transform_indices = @transform_2, window_bounds = array<i64: 1, 32>}, {transform_indices = @transform_3, window_bounds = array<i64: 4, 32>}]} {
    %c0 = arith.constant 0 : index
    %c0_0 = arith.constant 0 : index
    %0 = vector.load %arg1[%c0, %c0_0] : memref<4x128xf32, #tpu.memory_space<vmem>>, vector<4x128xf32>
    %c0_1 = arith.constant 0 : index
    %c0_2 = arith.constant 0 : index
    %1 = vector.load %arg2[%c0_1, %c0_2] : memref<128x32xf32, #tpu.memory_space<vmem>>, vector<128x32xf32>
    %cst = arith.constant dense<0.000000e+00> : vector<4x32xf32>
    %2 = tpu.matmul %0, %1, %cst {dimension_numbers = #tpu.dot_dimension_numbers<[1], [0], [0], [1], [0, 0, 1, 1], [], []>} : vector<4x128xf32>, vector<128x32xf32>, vector<4x32xf32> -> vector<4x32xf32>
    %c0_3 = arith.constant 0 : index
    %c0_4 = arith.constant 0 : index
    %3 = vector.load %arg3[%c0_3, %c0_4] : memref<1x32xf32, #tpu.memory_space<vmem>>, vector<1x32xf32>
    %4 = vector.broadcast %3 : vector<1x32xf32> to vector<4x32xf32>
    %5 = arith.addf %2, %4 : vector<4x32xf32>
    %c0_5 = arith.constant 0 : index
    %c0_6 = arith.constant 0 : index
    %6 = vector.load %arg4[%c0_5, %c0_6] : memref<4x32xf32, #tpu.memory_space<vmem>>, vector<4x32xf32>
    tpu.vector_store %arg4[%c0_5, %c0_6], %5 {strides = array<i32>} : memref<4x32xf32, #tpu.memory_space<vmem>>, vector<4x32xf32>,
    return
  }
  func.func @transform_0(%arg0: i32) -> (i32, i32) {
    %c0_i32 = arith.constant 0 : i32
    %c0_i32_0 = arith.constant 0 : i32
    return %arg0, %c0_i32 : i32, i32
  }
  func.func @transform_1(%arg0: i32) -> (i32, i32) {
    %c0_i32 = arith.constant 0 : i32
    %c0_i32_0 = arith.constant 0 : i32
    %c0_i32_1 = arith.constant 0 : i32
    return %c0_i32, %c0_i32_0 : i32, i32
  }
  func.func @transform_2(%arg0: i32) -> (i32, i32) {
    %c0_i32 = arith.constant 0 : i32
    %c0_i32_0 = arith.constant 0 : i32
    %c0_i32_1 = arith.constant 0 : i32
    return %c0_i32, %c0_i32_0 : i32, i32
  }
  func.func @transform_3(%arg0: i32) -> (i32, i32) {
    %c0_i32 = arith.constant 0 : i32
    %c0_i32_0 = arith.constant 0 : i32
    return %arg0, %c0_i32 : i32, i32
  }
}

module attributes {stable_mosaic.version = 11 : i64} {
  func.func @_gat_bn_kernel(%arg0: i32, %arg1: memref<16x4xf32, #tpu.memory_space<vmem>>, %arg2: memref<16x4xf32, #tpu.memory_space<vmem>>, %arg3: memref<1x4xf32, #tpu.memory_space<vmem>>, %arg4: memref<16x128xf32, #tpu.memory_space<vmem>>, %arg5: memref<16x128xf32, #tpu.memory_space<vmem>>, %arg6: memref<1x128xf32, #tpu.memory_space<vmem>>, %arg7: memref<4x128xf32, #tpu.memory_space<vmem>>, %arg8: memref<128x32xf32, #tpu.memory_space<vmem>>, %arg9: memref<32x128xf32, #tpu.memory_space<vmem>>, %arg10: memref<1x32xf32, #tpu.memory_space<vmem>>, %arg11: memref<1x32xf32, #tpu.memory_space<vmem>>, %arg12: memref<16x4xf32, #tpu.memory_space<vmem>>, %arg13: memref<16x128xf32, #tpu.memory_space<vmem>>, %arg14: memref<16x16xbf16, #tpu.memory_space<vmem>>, %arg15: memref<16x16xbf16, #tpu.memory_space<vmem>>, %arg16: memref<16x128xf32, #tpu.memory_space<vmem>>, %arg17: memref<16x128xf32, #tpu.memory_space<vmem>>, %arg18: memref<16x4xf32, #tpu.memory_space<vmem>>) attributes {dimension_semantics = [#tpu.dimension_semantics<arbitrary>], iteration_bounds = array<i64: 3>, scalar_prefetch = 0 : i64, scratch_operands = 2 : i64, tpu.core_type = #tpu.core_type<tc>, window_params = [{pipeline_mode = #tpu.pipeline_mode<synchronous>, transform_indices = @transform_0, window_bounds = array<i64: 16, 4>}, {pipeline_mode = #tpu.pipeline_mode<synchronous>, transform_indices = @transform_1, window_bounds = array<i64: 16, 4>}, {pipeline_mode = #tpu.pipeline_mode<synchronous>, transform_indices = @transform_2, window_bounds = array<i64: 1, 4>}, {pipeline_mode = #tpu.pipeline_mode<synchronous>, transform_indices = @transform_3, window_bounds = array<i64: 16, 128>}, {pipeline_mode = #tpu.pipeline_mode<synchronous>, transform_indices = @transform_4, window_bounds = array<i64: 16, 128>}, {pipeline_mode = #tpu.pipeline_mode<synchronous>, transform_indices = @transform_5, window_bounds = array<i64: 1, 128>}, {pipeline_mode = #tpu.pipeline_mode<synchronous>, transform_indices = @transform_6, window_bounds = array<i64: 4, 128>}, {pipeline_mode = #tpu.pipeline_mode<synchronous>, transform_indices = @transform_7, window_bounds = array<i64: 128, 32>}, {pipeline_mode = #tpu.pipeline_mode<synchronous>, transform_indices = @transform_8, window_bounds = array<i64: 32, 128>}, {pipeline_mode = #tpu.pipeline_mode<synchronous>, transform_indices = @transform_9, window_bounds = array<i64: 1, 32>}, {pipeline_mode = #tpu.pipeline_mode<synchronous>, transform_indices = @transform_10, window_bounds = array<i64: 1, 32>}, {transform_indices = @transform_11, window_bounds = array<i64: 16, 4>}, {transform_indices = @transform_12, window_bounds = array<i64: 16, 128>}, {transform_indices = @transform_13, window_bounds = array<i64: 16, 16>}, {transform_indices = @transform_14, window_bounds = array<i64: 16, 16>}, {pipeline_mode = #tpu.pipeline_mode<synchronous>, transform_indices = @transform_15, window_bounds = array<i64: 16, 128>}]} {
    %c0_i32 = arith.constant 0 : i32
    %0 = arith.cmpi eq, %arg0, %c0_i32 : i32
    %1 = arith.extui %0 : i1 to i32
    %c0_i32_0 = arith.constant 0 : i32
    %2 = arith.cmpi ne, %1, %c0_i32_0 : i32
    scf.if %2 {
      %cst_34 = arith.constant 0.000000e+00 : f32
      %44 = vector.broadcast %cst_34 : f32 to vector<16x128xf32>
      %c0_35 = arith.constant 0 : index
      %c0_36 = arith.constant 0 : index
      %45 = vector.load %arg17[%c0_35, %c0_36] : memref<16x128xf32, #tpu.memory_space<vmem>>, vector<16x128xf32>
      tpu.vector_store %arg17[%c0_35, %c0_36], %44 {strides = array<i32>} : memref<16x128xf32, #tpu.memory_space<vmem>>, vector<16x128xf32>,
      %cst_37 = arith.constant 0.000000e+00 : f32
      %46 = vector.broadcast %cst_37 : f32 to vector<16x4xf32>
      %c0_38 = arith.constant 0 : index
      %c0_39 = arith.constant 0 : index
      %47 = vector.load %arg18[%c0_38, %c0_39] : memref<16x4xf32, #tpu.memory_space<vmem>>, vector<16x4xf32>
      tpu.vector_store %arg18[%c0_38, %c0_39], %46 {strides = array<i32>} : memref<16x4xf32, #tpu.memory_space<vmem>>, vector<16x4xf32>,
    } else {
    }
    %c0 = arith.constant 0 : index
    %c0_1 = arith.constant 0 : index
    %3 = vector.load %arg14[%c0, %c0_1] : memref<16x16xbf16, #tpu.memory_space<vmem>>, vector<16x16xbf16>
    %c0_2 = arith.constant 0 : index
    %c0_3 = arith.constant 0 : index
    %4 = vector.load %arg15[%c0_2, %c0_3] : memref<16x16xbf16, #tpu.memory_space<vmem>>, vector<16x16xbf16>
    %c0_4 = arith.constant 0 : index
    %c0_5 = arith.constant 0 : index
    %5 = vector.load %arg1[%c0_4, %c0_5] : memref<16x4xf32, #tpu.memory_space<vmem>>, vector<16x4xf32>
    %6 = arith.truncf %5 : vector<16x4xf32> to vector<16x4xbf16>
    %c0_6 = arith.constant 0 : index
    %c0_7 = arith.constant 0 : index
    %7 = vector.load %arg2[%c0_6, %c0_7] : memref<16x4xf32, #tpu.memory_space<vmem>>, vector<16x4xf32>
    %8 = arith.truncf %7 : vector<16x4xf32> to vector<16x4xbf16>
    %c0_8 = arith.constant 0 : index
    %c0_9 = arith.constant 0 : index
    %9 = vector.load %arg4[%c0_8, %c0_9] : memref<16x128xf32, #tpu.memory_space<vmem>>, vector<16x128xf32>
    %10 = arith.truncf %9 : vector<16x128xf32> to vector<16x128xbf16>
    %c0_10 = arith.constant 0 : index
    %c0_11 = arith.constant 0 : index
    %11 = vector.load %arg13[%c0_10, %c0_11] : memref<16x128xf32, #tpu.memory_space<vmem>>, vector<16x128xf32>
    %cst = arith.constant dense<0.000000e+00> : vector<16x4xf32>
    %12 = tpu.matmul %3, %6, %cst {dimension_numbers = #tpu.dot_dimension_numbers<[1], [0], [0], [1], [0, 0, 1, 1], [], []>} : vector<16x16xbf16>, vector<16x4xbf16>, vector<16x4xf32> -> vector<16x4xf32>
    %cst_12 = arith.constant dense<0.000000e+00> : vector<16x4xf32>
    %13 = tpu.matmul %4, %8, %cst_12 {dimension_numbers = #tpu.dot_dimension_numbers<[1], [0], [0], [1], [0, 0, 1, 1], [], []>} : vector<16x16xbf16>, vector<16x4xbf16>, vector<16x4xf32> -> vector<16x4xf32>
    %14 = arith.addf %12, %13 : vector<16x4xf32>
    %c0_13 = arith.constant 0 : index
    %c0_14 = arith.constant 0 : index
    %15 = vector.load %arg12[%c0_13, %c0_14] : memref<16x4xf32, #tpu.memory_space<vmem>>, vector<16x4xf32>
    %16 = arith.addf %14, %15 : vector<16x4xf32>
    %cst_15 = arith.constant 0.000000e+00 : f32
    %17 = vector.broadcast %cst_15 : f32 to vector<16x4xf32>
    %18 = arith.cmpf oge, %16, %17 : vector<16x4xf32>
    %cst_16 = arith.constant 2.000000e-01 : f32
    %19 = vector.broadcast %cst_16 : f32 to vector<16x4xf32>
    %20 = arith.mulf %19, %16 : vector<16x4xf32>
    %21 = arith.select %18, %16, %20 : vector<16x4xi1>, vector<16x4xf32>
    %c0_17 = arith.constant 0 : index
    %c0_18 = arith.constant 0 : index
    %22 = vector.load %arg3[%c0_17, %c0_18] : memref<1x4xf32, #tpu.memory_space<vmem>>, vector<1x4xf32>
    %23 = vector.broadcast %22 : vector<1x4xf32> to vector<16x4xf32>
    %24 = arith.subf %21, %23 : vector<16x4xf32>
    %25 = math.exp %24 : vector<16x4xf32>
    %c0_19 = arith.constant 0 : index
    %c0_20 = arith.constant 0 : index
    %26 = vector.load %arg7[%c0_19, %c0_20] : memref<4x128xf32, #tpu.memory_space<vmem>>, vector<4x128xf32>
    %cst_21 = arith.constant dense<0.000000e+00> : vector<16x128xf32>
    %27 = tpu.matmul %25, %26, %cst_21 {dimension_numbers = #tpu.dot_dimension_numbers<[1], [0], [0], [1], [0, 0, 1, 1], [], []>} : vector<16x4xf32>, vector<4x128xf32>, vector<16x128xf32> -> vector<16x128xf32>
    %cst_22 = arith.constant dense<0.000000e+00> : vector<16x128xf32>
    %28 = tpu.matmul %3, %10, %cst_22 {dimension_numbers = #tpu.dot_dimension_numbers<[1], [0], [0], [1], [0, 0, 1, 1], [], []>} : vector<16x16xbf16>, vector<16x128xbf16>, vector<16x128xf32> -> vector<16x128xf32>
    %29 = arith.addf %28, %11 : vector<16x128xf32>
    %30 = arith.mulf %29, %27 : vector<16x128xf32>
    %c0_23 = arith.constant 0 : index
    %c0_24 = arith.constant 0 : index
    %31 = vector.load %arg17[%c0_23, %c0_24] : memref<16x128xf32, #tpu.memory_space<vmem>>, vector<16x128xf32>
    %32 = arith.truncf %30 : vector<16x128xf32> to vector<16x128xbf16>
    %cst_25 = arith.constant dense<0.000000e+00> : vector<16x128xf32>
    %33 = tpu.matmul %4, %32, %cst_25 {dimension_numbers = #tpu.dot_dimension_numbers<[0], [0], [1], [1], [0, 1, 1, 1], [], []>} : vector<16x16xbf16>, vector<16x128xbf16>, vector<16x128xf32> -> vector<16x128xf32>
    %34 = arith.addf %31, %33 : vector<16x128xf32>
    %c0_26 = arith.constant 0 : index
    %c0_27 = arith.constant 0 : index
    %35 = vector.load %arg17[%c0_26, %c0_27] : memref<16x128xf32, #tpu.memory_space<vmem>>, vector<16x128xf32>
    tpu.vector_store %arg17[%c0_26, %c0_27], %34 {strides = array<i32>} : memref<16x128xf32, #tpu.memory_space<vmem>>, vector<16x128xf32>,
    %c0_28 = arith.constant 0 : index
    %c0_29 = arith.constant 0 : index
    %36 = vector.load %arg18[%c0_28, %c0_29] : memref<16x4xf32, #tpu.memory_space<vmem>>, vector<16x4xf32>
    %37 = arith.truncf %25 : vector<16x4xf32> to vector<16x4xbf16>
    %cst_30 = arith.constant dense<0.000000e+00> : vector<16x4xf32>
    %38 = tpu.matmul %4, %37, %cst_30 {dimension_numbers = #tpu.dot_dimension_numbers<[0], [0], [1], [1], [0, 1, 1, 1], [], []>} : vector<16x16xbf16>, vector<16x4xbf16>, vector<16x4xf32> -> vector<16x4xf32>
    %39 = arith.addf %36, %38 : vector<16x4xf32>
    %c0_31 = arith.constant 0 : index
    %c0_32 = arith.constant 0 : index
    %40 = vector.load %arg18[%c0_31, %c0_32] : memref<16x4xf32, #tpu.memory_space<vmem>>, vector<16x4xf32>
    tpu.vector_store %arg18[%c0_31, %c0_32], %39 {strides = array<i32>} : memref<16x4xf32, #tpu.memory_space<vmem>>, vector<16x4xf32>,
    %c2_i32 = arith.constant 2 : i32
    %41 = arith.cmpi eq, %arg0, %c2_i32 : i32
    %42 = arith.extui %41 : i1 to i32
    %c0_i32_33 = arith.constant 0 : i32
    %43 = arith.cmpi ne, %42, %c0_i32_33 : i32
    scf.if %43 {
      %c0_34 = arith.constant 0 : index
      %c0_35 = arith.constant 0 : index
      %44 = vector.load %arg18[%c0_34, %c0_35] : memref<16x4xf32, #tpu.memory_space<vmem>>, vector<16x4xf32>
      %c0_36 = arith.constant 0 : index
      %c0_37 = arith.constant 0 : index
      %45 = vector.load %arg7[%c0_36, %c0_37] : memref<4x128xf32, #tpu.memory_space<vmem>>, vector<4x128xf32>
      %cst_38 = arith.constant dense<0.000000e+00> : vector<16x128xf32>
      %46 = tpu.matmul %44, %45, %cst_38 {dimension_numbers = #tpu.dot_dimension_numbers<[1], [0], [0], [1], [0, 0, 1, 1], [], []>} : vector<16x4xf32>, vector<4x128xf32>, vector<16x128xf32> -> vector<16x128xf32>
      %c0_39 = arith.constant 0 : index
      %c0_40 = arith.constant 0 : index
      %47 = vector.load %arg17[%c0_39, %c0_40] : memref<16x128xf32, #tpu.memory_space<vmem>>, vector<16x128xf32>
      %cst_41 = arith.constant 9.99999971E-10 : f32
      %48 = vector.broadcast %cst_41 : f32 to vector<16x128xf32>
      %49 = arith.addf %46, %48 : vector<16x128xf32>
      %50 = tpu.reciprocal %49 {approx = true} : vector<16x128xf32> -> vector<16x128xf32>
      %51 = arith.mulf %47, %50 : vector<16x128xf32>
      %c0_42 = arith.constant 0 : index
      %c0_43 = arith.constant 0 : index
      %52 = vector.load %arg5[%c0_42, %c0_43] : memref<16x128xf32, #tpu.memory_space<vmem>>, vector<16x128xf32>
      %53 = arith.addf %51, %52 : vector<16x128xf32>
      %c0_44 = arith.constant 0 : index
      %c0_45 = arith.constant 0 : index
      %54 = vector.load %arg6[%c0_44, %c0_45] : memref<1x128xf32, #tpu.memory_space<vmem>>, vector<1x128xf32>
      %55 = vector.broadcast %54 : vector<1x128xf32> to vector<16x128xf32>
      %56 = arith.addf %53, %55 : vector<16x128xf32>
      %cst_46 = arith.constant 0.000000e+00 : f32
      %57 = vector.broadcast %cst_46 : f32 to vector<16x128xf32>
      %58 = arith.subf %57, %56 : vector<16x128xf32>
      %59 = math.exp %58 : vector<16x128xf32>
      %cst_47 = arith.constant 1.000000e+00 : f32
      %60 = vector.broadcast %cst_47 : f32 to vector<16x128xf32>
      %61 = arith.addf %60, %59 : vector<16x128xf32>
      %cst_48 = arith.constant 1.000000e+00 : f32
      %62 = vector.broadcast %cst_48 : f32 to vector<16x128xf32>
      %63 = arith.divf %62, %61 : vector<16x128xf32>
      %64 = arith.mulf %56, %63 : vector<16x128xf32>
      %cst_49 = arith.constant dense<0.000000e+00> : vector<128xf32>
      %65 = vector.multi_reduction <add>, %64, %cst_49 [0] : vector<16x128xf32> to vector<128xf32>
      %66 = vector.shape_cast %65 : vector<128xf32> to vector<1x128xf32>
      %c0_50 = arith.constant 0 : index
      %c0_51 = arith.constant 0 : index
      %67 = vector.load %arg8[%c0_50, %c0_51] : memref<128x32xf32, #tpu.memory_space<vmem>>, vector<128x32xf32>
      %cst_52 = arith.constant dense<0.000000e+00> : vector<1x32xf32>
      %68 = tpu.matmul %66, %67, %cst_52 {dimension_numbers = #tpu.dot_dimension_numbers<[1], [0], [0], [1], [0, 0, 1, 1], [], []>} : vector<1x128xf32>, vector<128x32xf32>, vector<1x32xf32> -> vector<1x32xf32>
      %69 = arith.mulf %64, %64 : vector<16x128xf32>
      %cst_53 = arith.constant dense<0.000000e+00> : vector<128xf32>
      %70 = vector.multi_reduction <add>, %69, %cst_53 [0] : vector<16x128xf32> to vector<128xf32>
      %71 = vector.shape_cast %70 : vector<128xf32> to vector<1x128xf32>
      %c0_54 = arith.constant 0 : index
      %c0_55 = arith.constant 0 : index
      %72 = vector.load %arg8[%c0_54, %c0_55] : memref<128x32xf32, #tpu.memory_space<vmem>>, vector<128x32xf32>
      %cst_56 = arith.constant dense<0.000000e+00> : vector<1x32xf32>
      %73 = tpu.matmul %71, %72, %cst_56 {dimension_numbers = #tpu.dot_dimension_numbers<[1], [0], [0], [1], [0, 0, 1, 1], [], []>} : vector<1x128xf32>, vector<128x32xf32>, vector<1x32xf32> -> vector<1x32xf32>
      %cst_57 = arith.constant 6.400000e+01 : f32
      %74 = vector.broadcast %cst_57 : f32 to vector<1x32xf32>
      %75 = arith.divf %68, %74 : vector<1x32xf32>
      %cst_58 = arith.constant 6.400000e+01 : f32
      %76 = vector.broadcast %cst_58 : f32 to vector<1x32xf32>
      %77 = arith.divf %73, %76 : vector<1x32xf32>
      %78 = arith.mulf %75, %75 : vector<1x32xf32>
      %79 = arith.subf %77, %78 : vector<1x32xf32>
      %cst_59 = arith.constant 9.99999974E-6 : f32
      %80 = vector.broadcast %cst_59 : f32 to vector<1x32xf32>
      %81 = arith.addf %79, %80 : vector<1x32xf32>
      %82 = math.rsqrt %81 : vector<1x32xf32>
      %c0_60 = arith.constant 0 : index
      %c0_61 = arith.constant 0 : index
      %83 = vector.load %arg10[%c0_60, %c0_61] : memref<1x32xf32, #tpu.memory_space<vmem>>, vector<1x32xf32>
      %84 = arith.mulf %82, %83 : vector<1x32xf32>
      %c0_62 = arith.constant 0 : index
      %c0_63 = arith.constant 0 : index
      %85 = vector.load %arg11[%c0_62, %c0_63] : memref<1x32xf32, #tpu.memory_space<vmem>>, vector<1x32xf32>
      %86 = arith.mulf %75, %84 : vector<1x32xf32>
      %87 = arith.subf %85, %86 : vector<1x32xf32>
      %c0_64 = arith.constant 0 : index
      %c0_65 = arith.constant 0 : index
      %88 = vector.load %arg9[%c0_64, %c0_65] : memref<32x128xf32, #tpu.memory_space<vmem>>, vector<32x128xf32>
      %cst_66 = arith.constant dense<0.000000e+00> : vector<1x128xf32>
      %89 = tpu.matmul %84, %88, %cst_66 {dimension_numbers = #tpu.dot_dimension_numbers<[1], [0], [0], [1], [0, 0, 1, 1], [], []>} : vector<1x32xf32>, vector<32x128xf32>, vector<1x128xf32> -> vector<1x128xf32>
      %90 = vector.broadcast %89 : vector<1x128xf32> to vector<16x128xf32>
      %91 = arith.mulf %64, %90 : vector<16x128xf32>
      %c0_67 = arith.constant 0 : index
      %c0_68 = arith.constant 0 : index
      %92 = vector.load %arg9[%c0_67, %c0_68] : memref<32x128xf32, #tpu.memory_space<vmem>>, vector<32x128xf32>
      %cst_69 = arith.constant dense<0.000000e+00> : vector<1x128xf32>
      %93 = tpu.matmul %87, %92, %cst_69 {dimension_numbers = #tpu.dot_dimension_numbers<[1], [0], [0], [1], [0, 0, 1, 1], [], []>} : vector<1x32xf32>, vector<32x128xf32>, vector<1x128xf32> -> vector<1x128xf32>
      %94 = vector.broadcast %93 : vector<1x128xf32> to vector<16x128xf32>
      %95 = arith.addf %91, %94 : vector<16x128xf32>
      %c0_70 = arith.constant 0 : index
      %c0_71 = arith.constant 0 : index
      %96 = vector.load %arg16[%c0_70, %c0_71] : memref<16x128xf32, #tpu.memory_space<vmem>>, vector<16x128xf32>
      tpu.vector_store %arg16[%c0_70, %c0_71], %95 {strides = array<i32>} : memref<16x128xf32, #tpu.memory_space<vmem>>, vector<16x128xf32>,
    } else {
    }
    return
  }
  func.func @transform_0(%arg0: i32) -> (i32, i32) {
    %c0_i32 = arith.constant 0 : i32
    %c0_i32_0 = arith.constant 0 : i32
    %c0_i32_1 = arith.constant 0 : i32
    return %c0_i32, %c0_i32_0 : i32, i32
  }
  func.func @transform_1(%arg0: i32) -> (i32, i32) {
    %c0_i32 = arith.constant 0 : i32
    %c0_i32_0 = arith.constant 0 : i32
    %c0_i32_1 = arith.constant 0 : i32
    return %c0_i32, %c0_i32_0 : i32, i32
  }
  func.func @transform_2(%arg0: i32) -> (i32, i32) {
    %c0_i32 = arith.constant 0 : i32
    %c0_i32_0 = arith.constant 0 : i32
    %c0_i32_1 = arith.constant 0 : i32
    return %c0_i32, %c0_i32_0 : i32, i32
  }
  func.func @transform_3(%arg0: i32) -> (i32, i32) {
    %c0_i32 = arith.constant 0 : i32
    %c0_i32_0 = arith.constant 0 : i32
    %c0_i32_1 = arith.constant 0 : i32
    return %c0_i32, %c0_i32_0 : i32, i32
  }
  func.func @transform_4(%arg0: i32) -> (i32, i32) {
    %c0_i32 = arith.constant 0 : i32
    %c0_i32_0 = arith.constant 0 : i32
    %c0_i32_1 = arith.constant 0 : i32
    return %c0_i32, %c0_i32_0 : i32, i32
  }
  func.func @transform_5(%arg0: i32) -> (i32, i32) {
    %c0_i32 = arith.constant 0 : i32
    %c0_i32_0 = arith.constant 0 : i32
    %c0_i32_1 = arith.constant 0 : i32
    return %c0_i32, %c0_i32_0 : i32, i32
  }
  func.func @transform_6(%arg0: i32) -> (i32, i32) {
    %c0_i32 = arith.constant 0 : i32
    %c0_i32_0 = arith.constant 0 : i32
    %c0_i32_1 = arith.constant 0 : i32
    return %c0_i32, %c0_i32_0 : i32, i32
  }
  func.func @transform_7(%arg0: i32) -> (i32, i32) {
    %c0_i32 = arith.constant 0 : i32
    %c0_i32_0 = arith.constant 0 : i32
    %c0_i32_1 = arith.constant 0 : i32
    return %c0_i32, %c0_i32_0 : i32, i32
  }
  func.func @transform_8(%arg0: i32) -> (i32, i32) {
    %c0_i32 = arith.constant 0 : i32
    %c0_i32_0 = arith.constant 0 : i32
    %c0_i32_1 = arith.constant 0 : i32
    return %c0_i32, %c0_i32_0 : i32, i32
  }
  func.func @transform_9(%arg0: i32) -> (i32, i32) {
    %c0_i32 = arith.constant 0 : i32
    %c0_i32_0 = arith.constant 0 : i32
    %c0_i32_1 = arith.constant 0 : i32
    return %c0_i32, %c0_i32_0 : i32, i32
  }
  func.func @transform_10(%arg0: i32) -> (i32, i32) {
    %c0_i32 = arith.constant 0 : i32
    %c0_i32_0 = arith.constant 0 : i32
    %c0_i32_1 = arith.constant 0 : i32
    return %c0_i32, %c0_i32_0 : i32, i32
  }
  func.func @transform_11(%arg0: i32) -> (i32, i32) {
    %c0_i32 = arith.constant 0 : i32
    %c0_i32_0 = arith.constant 0 : i32
    return %arg0, %c0_i32 : i32, i32
  }
  func.func @transform_12(%arg0: i32) -> (i32, i32) {
    %c0_i32 = arith.constant 0 : i32
    %c0_i32_0 = arith.constant 0 : i32
    return %arg0, %c0_i32 : i32, i32
  }
  func.func @transform_13(%arg0: i32) -> (i32, i32) {
    %c0_i32 = arith.constant 0 : i32
    %c0_i32_0 = arith.constant 0 : i32
    return %arg0, %c0_i32 : i32, i32
  }
  func.func @transform_14(%arg0: i32) -> (i32, i32) {
    %c0_i32 = arith.constant 0 : i32
    %c0_i32_0 = arith.constant 0 : i32
    return %arg0, %c0_i32 : i32, i32
  }
  func.func @transform_15(%arg0: i32) -> (i32, i32) {
    %c0_i32 = arith.constant 0 : i32
    %c0_i32_0 = arith.constant 0 : i32
    %c0_i32_1 = arith.constant 0 : i32
    return %c0_i32, %c0_i32_0 : i32, i32
  }
}

</mosaic_0001>

<bundles_post_ra>
// kernel: graph_encoder_forward.9
= control target key start
LH: loop header
LB: loop body
LE: loop exit
PB: predicated region body
PF: predicated region fallthrough
CT: control target
= control target key end

     0   :  { %v253_v3 = vmov 0.0   ;;  %vm45_vm0 = vcmask 261120   ;;  %v30_v21 = vlaneseq  ;;  %vm206_vm1 = vcmask 64512   ;;  %s337_s1 = inlined_call_operand.vmem [shape: f32[32,264], index: 1, kind: input, shape index: {}]   ;;  %s338_s0 = inlined_call_operand.vmem [shape: f32[16,32], index: 0, kind: input, shape index: {}]   ;;  %s339_s2 = inlined_call_operand.vmem [shape: f32[1,264], index: 2, kind: input, shape index: {}]   ;;  %s340_s3 = inlined_call_operand.vmem [shape: f32[16,264], index: 3, kind: output, shape index: {}]  }
   0x1   :  { %v17_v0 = vld [vmem:[%s337_s1 + $0x8] sm:$0xff]  ;;  %v20_v1 = vld [vmem:[%s337_s1 + $0x20] sm:$0xff]  ;;  %116 = vmatprep.mubr.f32.mxu0 %v253_v3  ;;  %v19_v5 = vld [vmem:[%s337_s1 + $0x18] sm:$0xff] }
   0x2   :  { %v16_v2 = vld [vmem:[%s337_s1] sm:$0xff]  ;;  %v236_v4 = vpack.c.bf16 %v20_v1, %v17_v0  ;;  %v18_v6 = vld [vmem:[%s337_s1 + $0x10] sm:$0xff]  ;;  %v21_v7 = vld [vmem:[%s337_s1 + $0x28] sm:$0xff]  ;;  %v31_v22 = vshrl.u32 %v30_v21, 7 }
   0x3   :  { %v238_v8 = vpack.c.bf16 %v19_v5, %v16_v2  ;;  %v244_v9 = vpack.c.bf16 %v21_v7, %v18_v6  ;;  %v23_v10 = vld [vmem:[%s337_s1 + $0x38] sm:$0xff]  ;;  %v26_v11 = vld [vmem:[%s337_s1 + $0x50] sm:$0xff]  ;;  %v25_v14 = vld [vmem:[%s337_s1 + $0x48] sm:$0xff] }
   0x4   :  { %v22_v12 = vld [vmem:[%s337_s1 + $0x30] sm:$0xff]  ;;  %237 = vmatprep.subr.bf16.mxu0 %v236_v4  ;;  %v240_v13 = vpack.c.bf16 %v26_v11, %v23_v10  ;;  %v24_v15 = vld [vmem:[%s337_s1 + $0x40] sm:$0xff]  ;;  %v27_v16 = vld [vmem:[%s337_s1 + $0x58] sm:$0xff]  ;;  %v32_v23 = vsub.s32 0, %v31_v22  ;;  %v36_v25 = vsub.s32 1, %v31_v22  ;;  %v40_v26 = vsub.s32 2, %v31_v22 }
   0x5   :  { %239 = vmatpush1.bf16.msra.mxu0 %v238_v8  ;;  %245 = vmatprep.subr.bf16.mxu1 %v244_v9  ;;  %v242_v17 = vpack.c.bf16 %v25_v14, %v22_v12  ;;  %v248_v18 = vpack.c.bf16 %v27_v16, %v24_v15  ;;  %v14_v19 = vld [vmem:[%s338_s0] sm:$0xff]  ;;  %v15_v20 = vld [vmem:[%s338_s0 + $0x8] sm:$0xff] }
   0x6   :  { %241 = vmatprep.subr.bf16.mxu0 %v240_v13  ;;  %247 = vmatpush3.bf16.msra.mxu1 %v244_v9  ;;  %v28_v24 = vld [vmem:[%s339_s2] sm:$0x7] }
   0x7   :  { %249 = vmatprep.subr.bf16.mxu1 %v248_v18  ;;  %233 = vmatprep.mubr.msk.f32.mxu1 %vm45_vm0, %v14_v19  ;;  %v33_v27 = vrot.slane %v28_v24, %v32_v23  ;;  %v37_v28 = vrot.slane %v28_v24, %v36_v25  ;;  %v41_v29 = vrot.slane %v28_v24, %v40_v26 }
   0x9   :  { %243 = vmatpush1.bf16.msra.mxu0 %v242_v17 }
   0xa   :  { %251 = vmatpush3.bf16.msra.mxu1 %v248_v18 }
   0xc   :  { %215 = vmatmul.mubr.msk.f32.vlgmr.msra.gmra.mrb[0].mxu0 %vm45_vm0, %v14_v19 }
   0xd   :  { %122 = vmatprep.mubr.f32.mxu0 %v253_v3  ;;  %234 = vmatmul.mubr.msk.f32.vlgmr.msra.gmra.mrb[0].mxu1 %vm45_vm0, %v15_v20 }
  0x10   :  { %216 = vmatmul.mubr.msk.f32.gmra.mrb[2].mxu0 %vm45_vm0, %v15_v20 }
  0xdf   :  { %v118_v30 = vpop.f32.mrb[0].mxu0 }
  0xe0   :  { %v119_v31 = vadd.f32 %v118_v30, %v33_v27  ;;  %v120_v32 = vpop.f32.mrb[1].mxu0  ;;  %v235_v33 = vpop.f32.mrb[0].mxu1 }
  0xe1   :  { %v121_v34 = vadd.f32 %v120_v32, %v37_v28  ;;  %v201_v35 = vadd.f32 %v235_v33, %v41_v29  ;;  %v195_v36 = vpop.f32.mrb[1].mxu1 }
  0xe2   :  { %204 = vst [vmem:[%s340_s3] sm:$0xff] %v119_v31  ;;  %v196_v37 = vadd.f32 %v195_v36, %v41_v29 }
  0xe3   :  { %205 = vst [vmem:[%s340_s3 + $0x8] sm:$0xff] %v121_v34  ;;  %210 = vst.msk [vmem:[%s340_s3 + $0x28] sm:$0xff] %vm206_vm1, %v201_v35  ;;  %v124_v38 = vpop.f32.mrb[2].mxu0 }
  0xe4   :  { %v125_v39 = vadd.f32 %v124_v38, %v33_v27  ;;  %207 = vst.msk [vmem:[%s340_s3 + $0x10] sm:$0xff] %vm206_vm1, %v196_v37  ;;  %v126_v40 = vpop.f32.mrb[3].mxu0 }
  0xe5   :  { %v127_v41 = vadd.f32 %v126_v40, %v37_v28 }
  0xe6   :  { %208 = vst [vmem:[%s340_s3 + $0x18] sm:$0xff] %v125_v39 }
  0xe7   :  { %209 = vst [vmem:[%s340_s3 + $0x20] sm:$0xff] %v127_v41 }

// kernel: graph_encoder_forward.7
= control target key start
LH: loop header
LB: loop body
LE: loop exit
PB: predicated region body
PF: predicated region fallthrough
CT: control target
= control target key end

     0   :  { %vm31_vm0 = vcmask 1045504   ;;  %vm24_vm1 = vcmask 48128   ;;  %vm110_vm2 = vcmask 261120   ;;  %s167_s1 = inlined_call_operand.vmem [shape: f32[6,32], index: 1, kind: input, shape index: {}]   ;;  %s168_s0 = inlined_call_operand.vmem [shape: f32[16,6], index: 0, kind: input, shape index: {}]   ;;  %s169_s2 = inlined_call_operand.vmem [shape: f32[1,32], index: 2, kind: input, shape index: {}]   ;;  %s170_s3 = inlined_call_operand.vmem [shape: f32[16,32], index: 3, kind: output, shape index: {}]  }
   0x1   :  { %v16_v0 = vld [vmem:[%s167_s1] sm:$0x3f]  ;;  %v15_v2 = vld [vmem:[%s168_s0 + $0x8] sm:$0xff] }
   0x2   :  { %v14_v1 = vld [vmem:[%s168_s0] sm:$0xff]  ;;  %124 = vmatprep.subr.msk.mxu0 %vm31_vm0, %v16_v0 }
   0x3   :  { %126 = vmatprep.mubr.msk.f32.mxu0 %vm24_vm1, %v14_v1  ;;  %125 = vmatpush3.msk.msra.mxu0 %vm31_vm0, %v16_v0  ;;  %v117_v3 = vld [vmem:[%s169_s2] ss:$0 sm:$0xff] }
   0x4   :  { %127 = vmatmul.mubr.msk.f32.vlgmr.msra.gmra.mrb[0].mxu0 %vm24_vm1, %v15_v2 }
  0xd7   :  { %v128_v4 = vpop.f32.mrb[0].mxu0 }
  0xd8   :  { %v107_v5 = vadd.f32 %v128_v4, %v117_v3  ;;  %v101_v6 = vpop.f32.mrb[1].mxu0 }
  0xd9   :  { %v102_v7 = vadd.f32 %v117_v3, %v101_v6 }
  0xda   :  { %112 = vst.msk [vmem:[%s170_s3 + $0x8] sm:$0xff] %vm110_vm2, %v107_v5 }
  0xdb   :  { %111 = vst.msk [vmem:[%s170_s3] sm:$0xff] %vm110_vm2, %v102_v7 }

// kernel: eq.22
= control target key start
LH: loop header
LB: loop body
LE: loop exit
PB: predicated region body
PF: predicated region fallthrough
CT: control target
= control target key end

     0   :  { %vm7_vm0 = vcmask 261120   ;;  %s37_s8 = smov 32   ;;  %s38_s9 = smov 64   ;;  %vm13_vm1 = vcmask 1048320   ;;  %vm19_vm2 = vcmask 785920   ;;  %vm25_vm3 = vcmask 523520   ;;  %s55_s0 = inlined_call_operand.vmem [shape: s32[4,32], index: 0, kind: input, shape index: {}]   ;;  %s56_s1 = inlined_call_operand.vmem [shape: s32[128], index: 1, kind: output, shape index: {}]  }
   0x1   :  { %v4_v0 = vld [vmem:[%s55_s0] sm:$0xf]  ;;  %s36_s0 = smov 96  }
   0x2   :  { %5 = vst [vmem:[#allocation1] sm:$0xf] %v4_v0 }
   0x9   :  { %v10_v1 = vld [vmem:[#allocation1 + $0x3] sm:$0x1]   ;;  %v22_v2 = vld [vmem:[#allocation1 + $0x1] sm:$0x1]   ;;  %v6_v3 = vld [vmem:[#allocation1] sm:$0x1]  }
   0xa   :  { %11 = vrot.lane.b32.xlu0 %v10_v1, %s36_s0  ;;  %23 = vrot.lane.b32.xlu1 %v22_v2, %s37_s8  ;;  %v16_v4 = vld [vmem:[#allocation1 + $0x2] sm:$0x1]   ;;  %8 = vst.msk [vmem:[#allocation0] sm:$0x1] %vm7_vm0, %v6_v3  }
   0xe   :  { %17 = vrot.lane.b32.xlu0 %v16_v4, %s38_s9 }
  0x7c   :  { %v12_v5 = vpop.permute.xlu0 %11   ;;  %v24_v6 = vpop.permute.xlu1 %23  }
  0x7d   :  { %14 = vst.msk [vmem:[#allocation0] sm:$0x1] %vm13_vm1, %v12_v5  }
  0x80   :  { %v18_v7 = vpop.permute.xlu0 %17  }
  0x81   :  { %20 = vst.msk [vmem:[#allocation0] sm:$0x1] %vm19_vm2, %v18_v7  }
  0x82   :  { %26 = vst.msk [vmem:[#allocation0] sm:$0x1] %vm25_vm3, %v24_v6  }
  0x89   :  { %v30_v8 = vld [vmem:[#allocation0] sm:$0x1] }
  0x8a   :  { %32 = vst [vmem:[%s56_s1] sm:$0x1] %v30_v8 }

// kernel: graph_encoder_forward.8
= control target key start
LH: loop header
LB: loop body
LE: loop exit
PB: predicated region body
PF: predicated region fallthrough
CT: control target
= control target key end

     0   :  { %s388_s12 = smov 0   ;;  %s411_s0 = inlined_call_operand.vmem [shape: f32[48,5], index: 0, kind: input, shape index: {}]   ;;  %s412_s1 = inlined_call_operand.vmem [shape: f32[5,32], index: 1, kind: input, shape index: {}]   ;;  %s413_s2 = inlined_call_operand.vmem [shape: f32[1,32], index: 2, kind: input, shape index: {}]   ;;  %s414_s3 = inlined_call_operand.vmem [shape: f32[48,32], index: 3, kind: output, shape index: {}]  }
   0x1 LB: > { %s329_s13 = sadd.s32 4294967295, %s366_s12   ;;  %p333_p0 = scmp.ge.s32.totalorder %s366_s12, 1  ;;  %s366_s12 = sphi %s388_s12, %s13_s12  }
   0x2   : > { %p138_p1 = scmp.lt.s32.totalorder %s366_s12, 4 }
   0x4   : > { %p139_p2 = pnand %p333_p0, %p138_p1 }
   0x5   : > { %v176_v0 = vld [vmem:[%s412_s1] sm:$0x1f] (!%p139_p2)  ;;  %vm191_vm0 = vcmask (!%p139_p2), 1044480   ;;  %s334_s16 = sshll.u32 (!%p139_p2), %s329_s13, 1  ;;  %vm184_vm1 = vcmask (!%p139_p2), 39936   ;;  %vm270_vm2 = vcmask (!%p139_p2), 261120  }
   0x6   : > { %142 = sbr.rel (%p139_p2) target bundleno = 234 (0xea), region = 32  ;;  %347 = vmatprep.subr.msk.mxu0 (!%p139_p2), %vm191_vm0, %v176_v0  ;;  %p163_p3 = scmp.lt.s32.totalorder (!%p139_p2), %s334_s16, 5  ;;  %v338_v3 = vld [vmem:[%s413_s2] ss:$0 sm:$0xff] (!%p139_p2) }
   0x7   : > { %348 = vmatpush3.msk.msra.mxu0 (!%p139_p2), %vm191_vm0, %v176_v0 }
   0xd   : > { %s416_s16 = smov (!%p163_p3, %s334_s16), 5 }
   0xe   : > { %s335_s17 = sshll.u32 %s416_s16, 3 }
   0xf   : > { %s166_s20 = scalar_lea.vmem %s411_s0, %s335_s17  ;;  %s172_s25 = scalar_lea.vmem %s414_s3, %s335_s17 }
  0x10   : > { %v174_v1 = vld [vmem:[%s166_s20] sm:$0xff]  ;;  %v175_v2 = vld [vmem:[%s166_s20 + $0x8] sm:$0xff] }
  0x11   : > { %349 = vmatprep.mubr.msk.f32.mxu0 %vm184_vm1, %v174_v1 }
  0x12   : > { %350 = vmatmul.mubr.msk.f32.vlgmr.msra.gmra.mrb[0].mxu0 %vm184_vm1, %v175_v2 }
  0xe5   : > { %v351_v4 = vpop.f32.mrb[0].mxu0 }
  0xe6   : > { %v261_v5 = vpop.f32.mrb[1].mxu0  ;;  %v267_v7 = vadd.f32 %v351_v4, %v338_v3 }
  0xe7   : > { %v262_v6 = vadd.f32 %v338_v3, %v261_v5 }
  0xe8   : > { %272 = vst.msk [vmem:[%s172_s25 + $0x8] sm:$0xff] %vm270_vm2, %v267_v7 }
  0xe9   : > { %271 = vst.msk [vmem:[%s172_s25] sm:$0xff] %vm270_vm2, %v262_v6 }
  0xea PF: > { %s13_s12 = sadd.s32 1, %s366_s12  }
  0xeb   : > { %p10_p4 = scmp.ge.s32.totalorder %s13_s12, 5  }
  0xed   :  { %12 = sbr.rel (!%p10_p4) target bundleno = 1 (0x1), region = 62 }

// kernel: graph_encoder_forward.10
= control target key start
LH: loop header
LB: loop body
LE: loop exit
PB: predicated region body
PF: predicated region fallthrough
CT: control target
= control target key end

     0   :  { %s410_s12 = smov 0   ;;  %s454_s0 = inlined_call_operand.vmem [shape: f32[48,32], index: 0, kind: input, shape index: {}]   ;;  %s455_s1 = inlined_call_operand.vmem [shape: f32[32,132], index: 1, kind: input, shape index: {}]   ;;  %s456_s2 = inlined_call_operand.vmem [shape: f32[1,132], index: 2, kind: input, shape index: {}]   ;;  %s457_s3 = inlined_call_operand.vmem [shape: f32[48,132], index: 3, kind: output, shape index: {}]  }
   0x1 LB: > { %s345_s13 = sadd.s32 4294967295, %s387_s12   ;;  %p349_p0 = scmp.ge.s32.totalorder %s387_s12, 1  ;;  %s387_s12 = sphi %s410_s12, %s13_s12  }
   0x2   : > { %p138_p1 = scmp.lt.s32.totalorder %s387_s12, 4 }
   0x4   : > { %p139_p2 = pnand %p349_p0, %p138_p1 }
   0x5   : > { %v179_v0 = vld [vmem:[%s455_s1 + $0x8] sm:$0xff] (!%p139_p2)  ;;  %v181_v1 = vld [vmem:[%s455_s1 + $0x18] sm:$0xff] (!%p139_p2)  ;;  %v178_v2 = vld [vmem:[%s455_s1] sm:$0xff] (!%p139_p2)  ;;  %s350_s20 = sshll.u32 (!%p139_p2), %s345_s13, 1  ;;  %v389_v7 = vmov (!%p139_p2), 0.0   ;;  %vm198_vm0 = vcmask (!%p139_p2), 261120   ;;  %v188_v15 = vlaneseq (!%p139_p2) }
   0x6   : > { %142 = sbr.rel (%p139_p2) target bundleno = 233 (0xe9), region = 32  ;;  %v360_v3 = vpack.c.bf16 (!%p139_p2), %v181_v1, %v179_v0  ;;  %v180_v4 = vld [vmem:[%s455_s1 + $0x10] sm:$0xff] (!%p139_p2)  ;;  %v183_v5 = vld [vmem:[%s455_s1 + $0x28] sm:$0xff] (!%p139_p2)  ;;  %v185_v6 = vld [vmem:[%s455_s1 + $0x38] sm:$0xff] (!%p139_p2)  ;;  %269 = vmatprep.mubr.f32.mxu0 (!%p139_p2), %v389_v7  ;;  %275 = vmatprep.mubr.f32.mxu1 (!%p139_p2), %v389_v7  ;;  %p164_p3 = scmp.lt.s32.totalorder (!%p139_p2), %s350_s20, 5  ;;  %vm283_vm1 = vcmask (!%p139_p2), 31744  }
   0x7   : > { %v362_v8 = vpack.c.bf16 (!%p139_p2), %v180_v4, %v178_v2  ;;  %v364_v9 = vpack.c.bf16 (!%p139_p2), %v185_v6, %v183_v5  ;;  %v182_v10 = vld [vmem:[%s455_s1 + $0x20] sm:$0xff] (!%p139_p2)  ;;  %v184_v11 = vld [vmem:[%s455_s1 + $0x30] sm:$0xff] (!%p139_p2)  ;;  %v189_v16 = vshrl.u32 (!%p139_p2), %v188_v15, 7 }
   0x8   : > { %361 = vmatprep.subr.bf16.mxu0 (!%p139_p2), %v360_v3  ;;  %368 = vmatprep.subr.bf16.mxu1 (!%p139_p2), %v360_v3  ;;  %v366_v12 = vpack.c.bf16 (!%p139_p2), %v184_v11, %v182_v10  ;;  %v186_v18 = vld [vmem:[%s456_s2] sm:$0x3] (!%p139_p2) }
   0x9   : > { %363 = vmatpush1.bf16.msra.mxu0 (!%p139_p2), %v362_v8  ;;  %370 = vmatpush1.bf16.msra.mxu1 (!%p139_p2), %v362_v8  ;;  %v190_v17 = vsub.s32 (!%p139_p2), 0, %v189_v16  ;;  %v194_v19 = vsub.s32 (!%p139_p2), 1, %v189_v16 }
   0xa   : > { %365 = vmatprep.subr.bf16.mxu0 (!%p139_p2), %v364_v9  ;;  %369 = vmatprep.subr.bf16.mxu1 (!%p139_p2), %v364_v9 }
   0xb   : > { %v191_v20 = vrot.slane (!%p139_p2), %v186_v18, %v190_v17  ;;  %v195_v21 = vrot.slane (!%p139_p2), %v186_v18, %v194_v19 }
   0xd   : > { %s459_s20 = smov (!%p164_p3, %s350_s20), 5  ;;  %367 = vmatpush1.bf16.msra.mxu0 %v366_v12  ;;  %371 = vmatpush1.bf16.msra.mxu1 %v366_v12 }
   0xe   : > { %s351_s4 = sshll.u32 %s459_s20, 3  ;;  %s359_s10 = sshll.u32 %s459_s20, 4 }
   0xf   : > { %s167_s7 = scalar_lea.vmem %s454_s0, %s351_s4  ;;  %s174_s14 = scalar_lea.vmem %s457_s3, %s359_s10 }
  0x10   : > { %v176_v13 = vld [vmem:[%s167_s7] sm:$0xff]  ;;  %v177_v14 = vld [vmem:[%s167_s7 + $0x8] sm:$0xff] }
  0x11   : > { %355 = vmatmul.mubr.msk.f32.vlgmr.msra.gmra.mrb[0].mxu0 %vm198_vm0, %v176_v13  ;;  %356 = vmatmul.mubr.msk.f32.vlgmr.msra.gmra.mrb[0].mxu1 %vm198_vm0, %v177_v14 }
  0xe4   : > { %v271_v22 = vpop.f32.mrb[0].mxu0  ;;  %v277_v23 = vpop.f32.mrb[0].mxu1 }
  0xe5   : > { %v272_v24 = vadd.f32 %v271_v22, %v191_v20  ;;  %v278_v25 = vadd.f32 %v277_v23, %v191_v20  ;;  %v273_v26 = vpop.f32.mrb[1].mxu0  ;;  %v279_v27 = vpop.f32.mrb[1].mxu1 }
  0xe6   : > { %v274_v28 = vadd.f32 %v273_v26, %v195_v21  ;;  %v280_v29 = vadd.f32 %v279_v27, %v195_v21 }
  0xe7   : > { %282 = vst [vmem:[%s174_s14] sm:$0xff] %v272_v24  ;;  %285 = vst [vmem:[%s174_s14 + $0x10] sm:$0xff] %v278_v25 }
  0xe8   : > { %284 = vst.msk [vmem:[%s174_s14 + $0x8] sm:$0xff] %vm283_vm1, %v274_v28  ;;  %286 = vst.msk [vmem:[%s174_s14 + $0x18] sm:$0xff] %vm283_vm1, %v280_v29 }
  0xe9 PF: > { %s13_s12 = sadd.s32 1, %s387_s12  }
  0xea   : > { %p10_p4 = scmp.ge.s32.totalorder %s13_s12, 5  }
  0xec   :  { %12 = sbr.rel (!%p10_p4) target bundleno = 1 (0x1), region = 62 }

// kernel: graph_encoder_forward.12
= control target key start
LH: loop header
LB: loop body
LE: loop exit
PB: predicated region body
PF: predicated region fallthrough
CT: control target
= control target key end

     0   :  { %v121_v0 = vmov 0.0|0.0   ;;  %vm122_vm0 = vmmov 0   ;;  %v123_v3 = vmov 0.0   ;;  %vm24_vm1 = vcmask 130048   ;;  %s159_s1 = inlined_call_operand.vmem [shape: f32[16,128], index: 1, kind: input, shape index: {}]   ;;  %s160_s0 = inlined_call_operand.vmem [shape: f32[2,16], index: 0, kind: input, shape index: {}]   ;;  %s161_s2 = inlined_call_operand.vmem [shape: f32[1,128], index: 2, kind: input, shape index: {}]   ;;  %s162_s3 = inlined_call_operand.vmem [shape: f32[2,128], index: 3, kind: output, shape index: {}]  }
   0x1   :  { %115 = vmatprep.subr.bf16.mxu0 %v121_v0  ;;  %v15_v1 = vld [vmem:[%s159_s1] sm:$0xff]  ;;  %v16_v2 = vld [vmem:[%s159_s1 + $0x8] sm:$0xff]  ;;  %112 = vmatprep.mubr.msk.f32.mxu0 %vm122_vm0, %v123_v3 }
   0x2   :  { %v116_v4 = vpack.c.bf16 %v16_v2, %v15_v1  ;;  %v14_v5 = vld [vmem:[%s160_s0] sm:$0x3] }
   0x3   :  { %v103_v6 = vld [vmem:[%s161_s2] ss:$0 sm:$0xff] }
   0x4   :  { %117 = vmatpush3.bf16.msra.mxu0 %v116_v4 }
   0x7   :  { %113 = vmatmul.mubr.msk.f32.vlgmr.msra.gmra.mrb[0].mxu0 %vm24_vm1, %v14_v5 }
  0xda   :  { %v94_v7 = vpop.f32.mrb[0].mxu0 }
  0xdb   :  { %v95_v8 = vadd.f32 %v103_v6, %v94_v7  ;;  %v114_v9 = vpop.f32.mrb[1].mxu0 }
  0xdd   :  { %98 = vst [vmem:[%s162_s3] sm:$0x3] %v95_v8 }

// kernel: graph_encoder_forward.13
= control target key start
LH: loop header
LB: loop body
LE: loop exit
PB: predicated region body
PF: predicated region fallthrough
CT: control target
= control target key end

     0   :  { %v194_v0 = vmov 0.0|0.0   ;;  %vm195_vm0 = vmmov 0   ;;  %v196_v4 = vmov 0.0   ;;  %vm108_vm1 = vcmask 257024   ;;  %s274_s1 = inlined_call_operand.vmem [shape: f32[128,32], index: 1, kind: input, shape index: {}]   ;;  %s275_s0 = inlined_call_operand.vmem [shape: f32[4,128], index: 0, kind: input, shape index: {}]   ;;  %s276_s2 = inlined_call_operand.vmem [shape: f32[1,32], index: 2, kind: input, shape index: {}]   ;;  %s277_s3 = inlined_call_operand.vmem [shape: f32[4,32], index: 3, kind: output, shape index: {}]  }
   0x1   :  { %167 = vmatprep.subr.bf16.mxu0 %v194_v0  ;;  %v15_v1 = vld [vmem:[%s274_s1] sm:$0xff]  ;;  %v16_v2 = vld [vmem:[%s274_s1 + $0x8] sm:$0xff]  ;;  %v17_v3 = vld [vmem:[%s274_s1 + $0x10] sm:$0xff]  ;;  %164 = vmatprep.mubr.msk.f32.mxu0 %vm195_vm0, %v196_v4 }
   0x2   :  { %v168_v5 = vpack.c.bf16 %v16_v2, %v15_v1  ;;  %v18_v6 = vld [vmem:[%s274_s1 + $0x18] sm:$0xff]  ;;  %v19_v8 = vld [vmem:[%s274_s1 + $0x20] sm:$0xff]  ;;  %v20_v9 = vld [vmem:[%s274_s1 + $0x28] sm:$0xff] }
   0x3   :  { %v171_v7 = vpack.c.bf16 %v18_v6, %v17_v3  ;;  %v174_v10 = vpack.c.bf16 %v20_v9, %v19_v8  ;;  %v21_v11 = vld [vmem:[%s274_s1 + $0x30] sm:$0xff]  ;;  %v22_v12 = vld [vmem:[%s274_s1 + $0x38] sm:$0xff]  ;;  %v23_v14 = vld [vmem:[%s274_s1 + $0x40] sm:$0xff] }
   0x4   :  { %169 = vmatpush3.bf16.msra.mxu0 %v168_v5  ;;  %v177_v13 = vpack.c.bf16 %v22_v12, %v21_v11  ;;  %v24_v15 = vld [vmem:[%s274_s1 + $0x48] sm:$0xff]  ;;  %v25_v17 = vld [vmem:[%s274_s1 + $0x50] sm:$0xff]  ;;  %v26_v18 = vld [vmem:[%s274_s1 + $0x58] sm:$0xff] }
   0x5   :  { %170 = vmatprep.subr.bf16.mxu0 %v194_v0  ;;  %v180_v16 = vpack.c.bf16 %v24_v15, %v23_v14  ;;  %v183_v19 = vpack.c.bf16 %v26_v18, %v25_v17  ;;  %v27_v20 = vld [vmem:[%s274_s1 + $0x60] sm:$0xff]  ;;  %v28_v21 = vld [vmem:[%s274_s1 + $0x68] sm:$0xff]  ;;  %v29_v23 = vld [vmem:[%s274_s1 + $0x70] sm:$0xff] }
   0x6   :  { %v186_v22 = vpack.c.bf16 %v28_v21, %v27_v20  ;;  %v30_v24 = vld [vmem:[%s274_s1 + $0x78] sm:$0xff]  ;;  %v14_v26 = vld [vmem:[%s275_s0] sm:$0xf] }
   0x7   :  { %v189_v25 = vpack.c.bf16 %v30_v24, %v29_v23  ;;  %v114_v27 = vld [vmem:[%s276_s2] ss:$0 sm:$0xff] }
   0x8   :  { %172 = vmatpush3.bf16.msra.mxu0 %v171_v7 }
   0x9   :  { %173 = vmatprep.subr.bf16.mxu0 %v194_v0 }
   0xc   :  { %175 = vmatpush3.bf16.msra.mxu0 %v174_v10 }
   0xd   :  { %176 = vmatprep.subr.bf16.mxu0 %v194_v0 }
  0x10   :  { %178 = vmatpush3.bf16.msra.mxu0 %v177_v13 }
  0x11   :  { %179 = vmatprep.subr.bf16.mxu0 %v194_v0 }
  0x14   :  { %181 = vmatpush3.bf16.msra.mxu0 %v180_v16 }
  0x15   :  { %182 = vmatprep.subr.bf16.mxu0 %v194_v0 }
  0x18   :  { %184 = vmatpush3.bf16.msra.mxu0 %v183_v19 }
  0x19   :  { %185 = vmatprep.subr.bf16.mxu0 %v194_v0 }
  0x1c   :  { %187 = vmatpush3.bf16.msra.mxu0 %v186_v22 }
  0x1d   :  { %188 = vmatprep.subr.bf16.mxu0 %v194_v0 }
  0x20   :  { %190 = vmatpush3.bf16.msra.mxu0 %v189_v25 }
  0x23   :  { %165 = vmatmul.mubr.f32.vlgmr.msra.gmra.mrb[0].mxu0 %v14_v26 }
  0xf6   :  { %v104_v28 = vpop.f32.mrb[0].mxu0 }
  0xf7   :  { %v105_v29 = vadd.f32 %v114_v27, %v104_v28  ;;  %v166_v30 = vpop.f32.mrb[1].mxu0 }
  0xf9   :  { %109 = vst.msk [vmem:[%s277_s3] sm:$0xf] %vm108_vm1, %v105_v29 }

// kernel: graph_encoder_forward.11
= control target key start
LH: loop header
LB: loop body
LE: loop exit
PB: predicated region body
PF: predicated region fallthrough
CT: control target
= control target key end

     0   :  { %s1892_s18 = smov 0   ;;  %s2094_s0 = inlined_call_operand.vmem [shape: f32[16,4], index: 0, kind: input, shape index: {}]   ;;  %s2095_s1 = inlined_call_operand.vmem [shape: f32[16,4], index: 1, kind: input, shape index: {}]   ;;  %s2096_s2 = inlined_call_operand.vmem [shape: f32[1,4], index: 2, kind: input, shape index: {}]   ;;  %s2097_s3 = inlined_call_operand.vmem [shape: f32[16,128], index: 3, kind: input, shape index: {}]   ;;  %s2098_s4 = inlined_call_operand.vmem [shape: f32[16,128], index: 4, kind: input, shape index: {}]   ;;  %s2099_s5 = inlined_call_operand.vmem [shape: f32[1,128], index: 5, kind: input, shape index: {}]   ;;  %s2100_s6 = inlined_call_operand.vmem [shape: f32[4,128], index: 6, kind: input, shape index: {}]   ;;  %s2101_s7 = inlined_call_operand.vmem [shape: f32[128,32], index: 7, kind: input, shape index: {}]   ;;  %s2102_s8 = inlined_call_operand.vmem [shape: f32[32,128], index: 8, kind: input, shape index: {}]   ;;  %s2103_s9 = inlined_call_operand.vmem [shape: f32[1,32], index: 9, kind: input, shape index: {}]   ;;  %s2104_s10 = inlined_call_operand.vmem [shape: f32[1,32], index: 10, kind: input, shape index: {}]   ;;  %s2105_s11 = inlined_call_operand.vmem [shape: f32[48,4], index: 11, kind: input, shape index: {}]   ;;  %s2106_s12 = inlined_call_operand.vmem [shape: f32[48,128], index: 12, kind: input, shape index: {}]   ;;  %s2107_s13 = inlined_call_operand.vmem [shape: bf16[48,16], index: 13, kind: input, shape index: {}]   ;;  %s2108_s14 = inlined_call_operand.vmem [shape: bf16[48,16], index: 14, kind: input, shape index: {}]   ;;  %s2109_s15 = inlined_call_operand.vmem [shape: f32[16,128], index: 15, kind: output, shape index: {}]  }
   0x1   :  { %2112 = sst [smem:[#allocation5_spill]] %s2109_s15 }
   0x2 LB: > { %2113 = sst [smem:[#allocation4_spill]] %s1804_s18  ;;  %s1898_s19 = sadd.s32 4294967295, %s1804_s18   ;;  %s1804_s18 = sphi %s1892_s18, %s25_s18  }
   0x3   : > { %p1481_p0 = scmp.ge.s32.totalorder %s1804_s18, 1  ;;  %p466_p1 = scmp.lt.s32.totalorder %s1804_s18, 4 }
   0x5   : > { %p467_p2 = pnand %p1481_p0, %p466_p1 }
   0x6   : > { %s1482_s20 = sshll.u32 (!%p467_p2), %s1898_s19, 1  ;;  %p1490_p4 = scmp.ne.s32.totalorder (!%p467_p2), %s1898_s19, 0 }
   0x7   : > { %470 = sbr.rel (%p467_p2) target bundleno = 1223 (0x4c7), region = 80  ;;  %p525_p3 = scmp.lt.s32.totalorder (!%p467_p2), %s1482_s20, 5 }
   0xe   : > { %s2117_s20 = smov (!%p525_p3, %s1482_s20), 5  ;;  %552 = sbr.rel (%p1490_p4) target bundleno = 21 (0x15), region = 84 }
   0xf   : > { %s1483_s21 = sshll.u32 %s2117_s20, 3  ;;  %s1487_s22 = sshll.u32 %s2117_s20, 2  ;;  %vm555_vm0 = vcmask (!%p1490_p4), 31744   ;;  %v1806_v0 = vmov (!%p1490_p4), 0.0  }
  0x10   : > { %s1906_s25 = scalar_lea.vmem %s2105_s11, %s1483_s21  ;;  %s1911_s28 = scalar_lea.vmem %s2106_s12, %s1483_s21  ;;  %553 = vst [vmem:[#allocation2] sm:$0xff] (!%p1490_p4), %v1806_v0  ;;  %554 = vst [vmem:[#allocation2 + $0x8] sm:$0xff] (!%p1490_p4), %v1806_v0 }
  0x11   : > { %s540_s16 = scalar_lea.vmem %s2107_s13, %s1487_s22  ;;  %s546_s15 = scalar_lea.vmem %s2108_s14, %s1487_s22  ;;  %556 = vst.msk [vmem:[#allocation3] sm:$0xff] (!%p1490_p4), %vm555_vm0, %v1806_v0  ;;  %557 = vst.msk [vmem:[#allocation3 + $0x8] sm:$0xff] (!%p1490_p4), %vm555_vm0, %v1806_v0 }
  0x15 PF: > { %v565_v1 = vld [vmem:[%s2095_s1] sm:$0xff]  ;;  %v566_v2 = vld [vmem:[%s2095_s1 + $0x8] sm:$0xff]  ;;  %v1807_v4 = vmov 0.0   ;;  %vm1808_vm1 = vmmov 0   ;;  %vm578_vm2 = vcmask 130048   ;;  %vm703_vm3 = vcmask 1043456  }
  0x16   : > { %v562_v3 = vld [vmem:[%s2094_s0] sm:$0xff]  ;;  %1571 = vmatprep.subr.bf16.mxu0 %v1807_v4  ;;  %1577 = vmatprep.subr.bf16.mxu1 %v1807_v4  ;;  %v567_v5 = vpack.c.bf16 %v566_v2, %v565_v1  ;;  %v563_v6 = vld [vmem:[%s2094_s0 + $0x8] sm:$0xff]  ;;  %vm696_vm6 = vcmask 31744   ;;  %p1502_p5 = scmp.ne.s32.totalorder %s1898_s19, 2 }
  0x17   : > { %v564_v7 = vpack.c.bf16 %v563_v6, %v562_v3  ;;  %1573 = vmatprep.mubr.msk.bf16.mxu0 %vm1808_vm1, %v1807_v4  ;;  %1579 = vmatprep.mubr.msk.bf16.mxu1 %vm1808_vm1, %v1807_v4  ;;  %v1778_v8 = vld [vmem:[%s546_s15] sm:$0xff]   ;;  %v569_v11 = vld [vmem:[%s2097_s3 + $0x8] sm:$0xff]  ;;  %vm1810_vm7 = vmmov (!%p1502_p5), 0   ;;  %vm1253_vm8 = vcmask (!%p1502_p5), 261120   ;;  %s2114_s26 = sld [smem:[#allocation5_spill]] (!%p1502_p5) }
  0x18   : > { %1572 = vmatpush3.bf16.msra.mxu0 %v567_v5  ;;  %v1779_v9 = vld [vmem:[%s540_s16] sm:$0xff]   ;;  %829 = vxpose.xlu0.c.b16.start.end [1/1] (short) (narrow) %v1778_v8, 16  ;;  %v673_v22 = vld [vmem:[%s1906_s25 + $0x8] sm:$0xff]  ;;  %v893_v54 = vld [vmem:[#allocation3] sm:$0xff] }
  0x19   : > { %1578 = vmatpush3.bf16.msra.mxu1 %v564_v7  ;;  %v568_v10 = vld [vmem:[%s2097_s3] sm:$0xff]  ;;  %v572_v45 = vld [vmem:[%s1911_s28 + $0x8] sm:$0xff]  ;;  %v894_v59 = vld [vmem:[#allocation3 + $0x8] sm:$0xff] }
  0x1a   : > { %1588 = vmatprep.subr.bf16.mxu1 %v1807_v4  ;;  %v570_v12 = vpack.c.bf16 %v569_v11, %v568_v10  ;;  %v695_v13 = vld [vmem:[%s2100_s6] sm:$0xf]  ;;  %v826_v0 = vld [vmem:[#allocation2 + $0x8] sm:$0xff] }
  0x1b   : > { %1574 = vmatmul.mubr.msk.bf16.vlgmr.msra.gmra.mrb[0].mxu0 %vm578_vm2, %v1778_v8  ;;  %1583 = vmatprep.subr.msk.mxu0 %vm703_vm3, %v695_v13  ;;  %v672_v16 = vld [vmem:[%s1906_s25] sm:$0xff]  ;;  %v1073_v10 = vld [vmem:[%s2101_s7 + $0x8] sm:$0xff] (!%p1502_p5) }
  0x1c   : > { %1580 = vmatmul.mubr.msk.bf16.vlgmr.msra.gmra.mrb[0].mxu1 %vm578_vm2, %v1779_v9  ;;  %1584 = vmatpush3.msk.msra.mxu0 %vm703_vm3, %v695_v13  ;;  %v1495_v28 = vld [vmem:[%s2096_s2] ss:$0 sm:$0xff]  ;;  %v1074_v13 = vld [vmem:[%s2101_s7 + $0x10] sm:$0xff] (!%p1502_p5) }
  0x1d   : > { %1590 = vmatprep.mubr.msk.bf16.mxu1 %vm1808_vm1, %v1807_v4  ;;  %1589 = vmatpush3.bf16.msra.mxu1 %v570_v12  ;;  %v571_v46 = vld [vmem:[%s1911_s28] sm:$0xff]  ;;  %v1809_v12 = vmov (!%p1502_p5), 0.0|0.0  }
  0x1e   : > { %1600 = vmatprep.subr.bf16.mxu1 %v1807_v4  ;;  %1594 = vmatprep.subr.bf16.mxu0 %v1807_v4  ;;  %v825_v62 = vld [vmem:[#allocation2] sm:$0xff] }
  0x1f   : > { %v947_v6 = vld [vmem:[%s2100_s6] sm:$0xf] (!%p1502_p5) }
  0x24   : > { %1591 = vmatmul.mubr.msk.bf16.vlgmr.msra.gmra.mrb[4].mxu1 %vm578_vm2, %v1779_v9  ;;  %v1072_v9 = vld [vmem:[%s2101_s7] sm:$0xff] (!%p1502_p5) }
  0x25   : > { %1602 = vmatprep.mubr.msk.bf16.mxu1 %vm1808_vm1, %v1807_v4  ;;  %v1704_v11 = vpack.c.bf16 (!%p1502_p5), %v1073_v10, %v1072_v9 }
  0x7e   : > { %v837_v44 = vpop.trf.xlu0 }
  0xee   : > { %v616_v14 = vpop.f32.mrb[0].mxu0 }
  0xef   : > { %v665_v15 = vpop.f32.mrb[0].mxu1  ;;  %v1575_v17 = vpop.f32.mrb[1].mxu0 }
  0xf0   : > { %v666_v18 = vadd.f32 %v665_v15, %v616_v14  ;;  %v1581_v19 = vpop.f32.mrb[1].mxu1  ;;  %v619_v20 = vpop.f32.mrb[2].mxu0  ;;  %v1075_v14 = vld [vmem:[%s2101_s7 + $0x18] sm:$0xff] (!%p1502_p5)  ;;  %v1077_v17 = vld [vmem:[%s2101_s7 + $0x28] sm:$0xff] (!%p1502_p5) }
  0xf1   : > { %v668_v21 = vpop.f32.mrb[2].mxu1  ;;  %v1576_v23 = vpop.f32.mrb[3].mxu0  ;;  %v1707_v15 = vpack.c.bf16 (!%p1502_p5), %v1075_v14, %v1074_v13  ;;  %v1078_v19 = vld [vmem:[%s2101_s7 + $0x30] sm:$0xff] (!%p1502_p5) }
  0xf2   : > { %v674_v24 = vadd.f32 %v672_v16, %v666_v18  ;;  %v669_v25 = vadd.f32 %v668_v21, %v619_v20  ;;  %v1582_v26 = vpop.f32.mrb[3].mxu1  ;;  %v1076_v16 = vld [vmem:[%s2101_s7 + $0x20] sm:$0xff] (!%p1502_p5)  ;;  %v1079_v20 = vld [vmem:[%s2101_s7 + $0x38] sm:$0xff] (!%p1502_p5)  ;;  %v1811_v21 = vmov (!%p1502_p5), 0.0  }
  0xf3   : > { %v1710_v18 = vpack.c.bf16 (!%p1502_p5), %v1077_v17, %v1076_v16  ;;  %v1080_v23 = vld [vmem:[%s2101_s7 + $0x40] sm:$0xff] (!%p1502_p5)  ;;  %v1082_v26 = vld [vmem:[%s2101_s7 + $0x50] sm:$0xff] (!%p1502_p5) }
  0xf4   : > { %vm676_vm4 = vcmp.ge.f32.partialorder %v674_v24, 0.0  ;;  %v678_v27 = vmul.f32 0.2, %v674_v24  ;;  %v675_v29 = vadd.f32 %v673_v22, %v669_v25  ;;  %v1713_v22 = vpack.c.bf16 (!%p1502_p5), %v1079_v20, %v1078_v19  ;;  %v1249_v17 = vld [vmem:[%s2102_s8] sm:$0xff] (!%p1502_p5)  ;;  %v1251_v19 = vld [vmem:[%s2102_s8 + $0x10] sm:$0xff] (!%p1502_p5) }
  0xf6   : > { %v680_v30 = vsel %vm676_vm4, %v674_v24, %v678_v27  ;;  %vm677_vm5 = vcmp.ge.f32.partialorder %v675_v29, 0.0  ;;  %v679_v31 = vmul.f32 0.2, %v675_v29  ;;  %v1081_v24 = vld [vmem:[%s2101_s7 + $0x48] sm:$0xff] (!%p1502_p5)  ;;  %v1083_v27 = vld [vmem:[%s2101_s7 + $0x58] sm:$0xff] (!%p1502_p5) }
  0xf7   : > { %v689_v32 = vsub.f32 %v680_v30, %v1495_v28  ;;  %v816_v40 = vpop.f32.mrb[4].mxu1  ;;  %v1716_v25 = vpack.c.bf16 (!%p1502_p5), %v1081_v24, %v1080_v23  ;;  %v1085_v30 = vld [vmem:[%s2101_s7 + $0x68] sm:$0xff] (!%p1502_p5) }
  0xf8   : > { %v681_v33 = vsel %vm677_vm5, %v675_v29, %v679_v31  ;;  %v1592_v41 = vpop.f32.mrb[5].mxu1  ;;  %v817_v48 = vadd.f32 %v816_v40, %v571_v46  ;;  %v1084_v29 = vld [vmem:[%s2101_s7 + $0x60] sm:$0xff] (!%p1502_p5) }
  0xf9   : > { %v691_v34 = vmul.f32 1.442695, %v689_v32  ;;  %v690_v35 = vsub.f32 %v681_v33, %v1495_v28  ;;  %v819_v42 = vpop.f32.mrb[6].mxu1  ;;  %v1719_v28 = vpack.c.bf16 (!%p1502_p5), %v1083_v27, %v1082_v26  ;;  %v1722_v31 = vpack.c.bf16 (!%p1502_p5), %v1085_v30, %v1084_v29  ;;  %v1086_v32 = vld [vmem:[%s2101_s7 + $0x70] sm:$0xff] (!%p1502_p5)  ;;  %v1087_v33 = vld [vmem:[%s2101_s7 + $0x78] sm:$0xff] (!%p1502_p5) }
  0xfa   : > { %v1593_v43 = vpop.f32.mrb[7].mxu1  ;;  %v820_v47 = vadd.f32 %v819_v42, %v572_v45  ;;  %v1039_v42 = vld [vmem:[%s2098_s4 + $0x8] sm:$0xff] (!%p1502_p5)  ;;  %v1038_v45 = vld [vmem:[%s2098_s4] sm:$0xff] (!%p1502_p5) }
  0xfb   : > { %1780 = vpow2.f32 %v691_v34  ;;  %v693_v36 = vmul.f32 1.442695, %v690_v35  ;;  %v1725_v34 = vpack.c.bf16 (!%p1502_p5), %v1087_v33, %v1086_v32  ;;  %v1506_v46 = vld [vmem:[%s2099_s5] ss:$0 sm:$0xff] (!%p1502_p5) }
  0xfc   : > { %v1244_v32 = vld [vmem:[%s2103_s9] sm:$0x1] (!%p1502_p5) }
  0xfd   : > { %1782 = vpow2.f32 %v693_v36 }
 0x105   : > { %v1781_v37 = vpop.eup %1780 }
 0x106   : > { %1585 = vmatprep.mubr.msk.f32.mxu0 %vm696_vm6, %v1781_v37 }
 0x107   : > { %v1783_v38 = vpop.eup %1782 }
 0x108   : > { %1586 = vmatmul.mubr.msk.f32.vlgmr.msra.gmra.mrb[4].mxu0 %vm696_vm6, %v1783_v38  ;;  %v895_v39 = vpack.c.bf16 %v1783_v38, %v1781_v37 }
 0x109   : > { %1596 = vmatprep.mubr.msk.bf16.mxu0 %vm1808_vm1, %v1807_v4 }
 0x10a   : > { %1601 = vmatpush3.bf16.msra.mxu1 %v895_v39 }
 0x10b   : > { %1703 = vmatprep.subr.bf16.mxu1 (!%p1502_p5), %v1809_v12 }
 0x10d   : > { %1603 = vmatmul.mubr.msk.bf16.vlgmr.msra.gmra.mrb[8].mxu1 %vm578_vm2, %v837_v44 }
 0x10e   : > { %1705 = vmatpush3.bf16.msra.mxu1 (!%p1502_p5), %v1704_v11  ;;  %1643 = vmatprep.mubr.msk.f32.mxu1 (!%p1502_p5), %vm1810_vm7, %v1811_v21 }
 0x10f   : > { %1706 = vmatprep.subr.bf16.mxu1 (!%p1502_p5), %v1809_v12 }
 0x112   : > { %1708 = vmatpush3.bf16.msra.mxu1 (!%p1502_p5), %v1707_v15 }
 0x113   : > { %1709 = vmatprep.subr.bf16.mxu1 (!%p1502_p5), %v1809_v12 }
 0x116   : > { %1711 = vmatpush3.bf16.msra.mxu1 (!%p1502_p5), %v1710_v18 }
 0x117   : > { %1712 = vmatprep.subr.bf16.mxu1 (!%p1502_p5), %v1809_v12 }
 0x11a   : > { %1714 = vmatpush3.bf16.msra.mxu1 (!%p1502_p5), %v1713_v22 }
 0x11b   : > { %1715 = vmatprep.subr.bf16.mxu1 (!%p1502_p5), %v1809_v12 }
 0x11e   : > { %1717 = vmatpush3.bf16.msra.mxu1 (!%p1502_p5), %v1716_v25 }
 0x11f   : > { %1718 = vmatprep.subr.bf16.mxu1 (!%p1502_p5), %v1809_v12 }
 0x122   : > { %1720 = vmatpush3.bf16.msra.mxu1 (!%p1502_p5), %v1719_v28 }
 0x123   : > { %1721 = vmatprep.subr.bf16.mxu1 (!%p1502_p5), %v1809_v12 }
 0x126   : > { %1723 = vmatpush3.bf16.msra.mxu1 (!%p1502_p5), %v1722_v31 }
 0x127   : > { %1724 = vmatprep.subr.bf16.mxu1 (!%p1502_p5), %v1809_v12 }
 0x12a   : > { %1726 = vmatpush3.bf16.msra.mxu1 (!%p1502_p5), %v1725_v34 }
 0x12b   : > { %1751 = vmatprep.subr.bf16.mxu1 (!%p1502_p5), %v1809_v12 }
 0x1db   : > { %v1587_v49 = vpop.f32.mrb[4].mxu0 }
 0x1dc   : > { %v824_v50 = vmul.f32 %v1587_v49, %v820_v47  ;;  %v773_v51 = vpop.f32.mrb[5].mxu0 }
 0x1dd   : > { %v823_v52 = vmul.f32 %v817_v48, %v773_v51 }
 0x1df   : > { %v827_v53 = vpack.c.bf16 %v824_v50, %v823_v52 }
 0x1e0   : > { %v930_v55 = vpop.f32.mrb[8].mxu1 }
 0x1e1   : > { %1595 = vmatpush3.bf16.msra.mxu0 %v827_v53  ;;  %v937_v56 = vadd.f32 %v930_v55, %v893_v54  ;;  %v1604_v57 = vpop.f32.mrb[9].mxu1 }
 0x1e2   : > { %v933_v58 = vpop.f32.mrb[10].mxu1  ;;  %1606 = vmatprep.subr.msk.mxu0 (!%p1502_p5), %vm703_vm3, %v947_v6 }
 0x1e3   : > { %939 = vst.msk [vmem:[#allocation3] sm:$0xff] %vm696_vm6, %v937_v56  ;;  %v1605_v60 = vpop.f32.mrb[11].mxu1  ;;  %v938_v61 = vadd.f32 %v933_v58, %v894_v59 }
 0x1e4   : > { %1597 = vmatmul.mubr.msk.bf16.vlgmr.msra.gmra.mrb[8].mxu0 %vm578_vm2, %v837_v44 }
 0x1e5   : > { %940 = vst.msk [vmem:[#allocation3 + $0x8] sm:$0xff] %vm696_vm6, %v938_v61  ;;  %1607 = vmatpush3.msk.msra.mxu0 (!%p1502_p5), %vm703_vm3, %v947_v6 }
 0x1e6   : > { %1727 = vmatprep.subr.bf16.mxu0 (!%p1502_p5), %v1809_v12 }
 0x1ea   : > { %v945_v7 = vld [vmem:[#allocation3] sm:$0xff] (!%p1502_p5) }
 0x1eb   : > { %1608 = vmatprep.mubr.msk.f32.mxu0 (!%p1502_p5), %vm696_vm6, %v945_v7 }
 0x1ec   : > { %v946_v8 = vld [vmem:[#allocation3 + $0x8] sm:$0xff] (!%p1502_p5) }
 0x1ed   : > { %1609 = vmatmul.mubr.msk.f32.vlgmr.msra.gmra.mrb[0].mxu0 (!%p1502_p5), %vm696_vm6, %v946_v8 }
 0x1ee   : > { %1729 = vmatpush3.bf16.msra.mxu0 (!%p1502_p5), %v1704_v11  ;;  %1678 = vmatprep.mubr.msk.f32.mxu0 (!%p1502_p5), %vm1810_vm7, %v1811_v21 }
 0x1ef   : > { %1730 = vmatprep.subr.bf16.mxu0 (!%p1502_p5), %v1809_v12 }
 0x1f2   : > { %1732 = vmatpush3.bf16.msra.mxu0 (!%p1502_p5), %v1707_v15 }
 0x1f3   : > { %1733 = vmatprep.subr.bf16.mxu0 (!%p1502_p5), %v1809_v12 }
 0x1f6   : > { %1735 = vmatpush3.bf16.msra.mxu0 (!%p1502_p5), %v1710_v18  ;;  %v1250_v18 = vld [vmem:[%s2102_s8 + $0x8] sm:$0xff] (!%p1502_p5) }
 0x1f7   : > { %1736 = vmatprep.subr.bf16.mxu0 (!%p1502_p5), %v1809_v12  ;;  %v1752_v20 = vpack.c.bf16 (!%p1502_p5), %v1250_v18, %v1249_v17 }
 0x1fa   : > { %1738 = vmatpush3.bf16.msra.mxu0 (!%p1502_p5), %v1713_v22  ;;  %v1252_v22 = vld [vmem:[%s2102_s8 + $0x18] sm:$0xff] (!%p1502_p5) }
 0x1fb   : > { %1739 = vmatprep.subr.bf16.mxu0 (!%p1502_p5), %v1809_v12  ;;  %v1755_v23 = vpack.c.bf16 (!%p1502_p5), %v1252_v22, %v1251_v19 }
 0x1fe   : > { %1741 = vmatpush3.bf16.msra.mxu0 (!%p1502_p5), %v1716_v25 }
 0x1ff   : > { %1742 = vmatprep.subr.bf16.mxu0 (!%p1502_p5), %v1809_v12 }
 0x202   : > { %1744 = vmatpush3.bf16.msra.mxu0 (!%p1502_p5), %v1719_v28 }
 0x203   : > { %1745 = vmatprep.subr.bf16.mxu0 (!%p1502_p5), %v1809_v12 }
 0x206   : > { %1747 = vmatpush3.bf16.msra.mxu0 (!%p1502_p5), %v1722_v31 }
 0x207   : > { %1748 = vmatprep.subr.bf16.mxu0 (!%p1502_p5), %v1809_v12 }
 0x20a   : > { %1750 = vmatpush3.bf16.msra.mxu0 (!%p1502_p5), %v1725_v34 }
 0x20b   : > { %1757 = vmatprep.subr.bf16.mxu0 (!%p1502_p5), %v1809_v12 }
 0x2b6   : > { %944 = sbr.rel (%p1502_p5) target bundleno = 1223 (0x4c7), region = 88 }
 0x2b7   : > { %v882_v63 = vpop.f32.mrb[8].mxu0 }
 0x2b8   : > { %v889_v1 = vadd.f32 %v882_v63, %v825_v62  ;;  %v1598_v2 = vpop.f32.mrb[9].mxu0 }
 0x2b9   : > { %v885_v3 = vpop.f32.mrb[10].mxu0 }
 0x2ba   : > { %891 = vst [vmem:[#allocation2] sm:$0xff] %v889_v1  ;;  %v890_v4 = vadd.f32 %v885_v3, %v826_v0  ;;  %v1599_v5 = vpop.f32.mrb[11].mxu0 }
 0x2bc   : > { %892 = vst [vmem:[#allocation2 + $0x8] sm:$0xff] %v890_v4 }
 0x2c0   : > { %v1610_v35 = vpop.f32.mrb[0].mxu0 }
 0x2c1   : > { %v1031_v36 = vadd.f32 1e-09, %v1610_v35  ;;  %v1025_v37 = vpop.f32.mrb[1].mxu0  ;;  %v948_v40 = vld [vmem:[#allocation2] sm:$0xff] }
 0x2c2   : > { %v1026_v38 = vadd.f32 1e-09, %v1025_v37  ;;  %v1327_v37 = vlaneseq }
 0x2c3   : > { %1784 = vrcp.f32 %v1031_v36  ;;  %v949_v39 = vld [vmem:[#allocation2 + $0x8] sm:$0xff] }
 0x2c4   : > { %1786 = vrcp.f32 %v1026_v38  ;;  %v1328_v38 = vshrl.u32 %v1327_v37, 7 }
 0x2cd   : > { %v1785_v41 = vpop.eup %1784 }
 0x2ce   : > { %v1787_v43 = vpop.eup %1786  ;;  %v1037_v44 = vmul.f32 %v1785_v41, %v949_v39  ;;  %v1329_v39 = vsub.s32 0, %v1328_v38 }
 0x2cf   : > { %v1036_v47 = vmul.f32 %v1787_v43, %v948_v40 }
 0x2d0   : > { %v1041_v48 = vadd.f32 %v1039_v42, %v1037_v44 }
 0x2d1   : > { %v1040_v49 = vadd.f32 %v1038_v45, %v1036_v47 }
 0x2d2   : > { %v1050_v50 = vadd.f32 %v1506_v46, %v1041_v48 }
 0x2d3   : > { %v1049_v51 = vadd.f32 %v1506_v46, %v1040_v49 }
 0x2d4   : > { %v1052_v52 = vsub.f32 0.0, %v1050_v50 }
 0x2d5   : > { %v1051_v53 = vsub.f32 0.0, %v1049_v51 }
 0x2d6   : > { %v1055_v54 = vmul.f32 1.442695, %v1052_v52 }
 0x2d7   : > { %v1053_v55 = vmul.f32 1.442695, %v1051_v53 }
 0x2d8   : > { %1788 = vpow2.f32 %v1055_v54 }
 0x2d9   : > { %1790 = vpow2.f32 %v1053_v55 }
 0x2e2   : > { %v1789_v56 = vpop.eup %1788 }
 0x2e3   : > { %v1791_v57 = vpop.eup %1790  ;;  %v1058_v58 = vadd.f32 1.0, %v1789_v56 }
 0x2e4   : > { %v1057_v59 = vadd.f32 1.0, %v1791_v57 }
 0x2e5   : > { %1792 = vrcp.f32 %v1058_v58 }
 0x2e6   : > { %1794 = vrcp.f32 %v1057_v59 }
 0x2ef   : > { %v1793_v60 = vpop.eup %1792 }
 0x2f0   : > { %v1795_v61 = vpop.eup %1794  ;;  %v1064_v62 = vmul.f32 %v1793_v60, %v1050_v50 }
 0x2f1   : > { %v1063_v63 = vmul.f32 %v1795_v61, %v1049_v51 }
 0x2f2   : > { %v1159_v0 = vmul.f32 %v1064_v62, %v1064_v62 }
 0x2f3   : > { %v1065_v1 = vadd.f32 %v1064_v62, %v1063_v63  ;;  %v1158_v2 = vmul.f32 %v1063_v63, %v1063_v63 }
 0x2f5   : > { %v1066_v3 = vrot.slane %v1065_v1, 4  ;;  %v1160_v4 = vadd.f32 %v1159_v0, %v1158_v2 }
 0x2f7   : > { %v1067_v5 = vadd.f32 %v1066_v3, %v1065_v1  ;;  %v1161_v6 = vrot.slane %v1160_v4, 4 }
 0x2f9   : > { %v1068_v7 = vrot.slane %v1067_v5, 2  ;;  %v1162_v8 = vadd.f32 %v1161_v6, %v1160_v4 }
 0x2fb   : > { %v1069_v9 = vadd.f32 %v1068_v7, %v1067_v5  ;;  %v1163_v10 = vrot.slane %v1162_v8, 2 }
 0x2fd   : > { %v1070_v11 = vrot.slane %v1069_v9, 1  ;;  %v1164_v13 = vadd.f32 %v1163_v10, %v1162_v8 }
 0x2ff   : > { %v1071_v14 = vadd.f32 %v1070_v11, %v1069_v9  ;;  %v1165_v15 = vrot.slane %v1164_v13, 1 }
 0x301   : > { %1644 = vmatmul.mubr.f32.vlgmr.msra.gmra.mrb[0].mxu1 %v1071_v14  ;;  %v1166_v16 = vadd.f32 %v1165_v15, %v1164_v13 }
 0x302   : > { %1689 = vmatprep.mubr.msk.f32.mxu1 %vm1810_vm7, %v1811_v21  ;;  %1753 = vmatpush3.bf16.msra.mxu1 %v1752_v20 }
 0x303   : > { %1679 = vmatmul.mubr.f32.vlgmr.msra.gmra.mrb[2].mxu0 %v1166_v16  ;;  %1754 = vmatprep.subr.bf16.mxu1 %v1809_v12 }
 0x304   : > { %1700 = vmatprep.mubr.msk.f32.mxu0 %vm1810_vm7, %v1811_v21  ;;  %1759 = vmatpush3.bf16.msra.mxu0 %v1752_v20 }
 0x305   : > { %1760 = vmatprep.subr.bf16.mxu0 %v1809_v12  ;;  %v1246_v12 = vld [vmem:[%s2104_s10] sm:$0x1] }
 0x306   : > { %1756 = vmatpush3.bf16.msra.mxu1 %v1755_v23 }
 0x308   : > { %1762 = vmatpush3.bf16.msra.mxu0 %v1755_v23 }
 0x3d4   : > { %v1154_v21 = vpop.f32.mrb[0].mxu1 }
 0x3d5   : > { %v1238_v24 = vmul.f32 0.015625, %v1154_v21  ;;  %v1645_v25 = vpop.f32.mrb[1].mxu1 }
 0x3d6   : > { %v1233_v26 = vpop.f32.mrb[2].mxu0 }
 0x3d7   : > { %v1240_v27 = vmul.f32 %v1238_v24, %v1238_v24  ;;  %v1239_v28 = vmul.f32 0.015625, %v1233_v26  ;;  %v1680_v29 = vpop.f32.mrb[3].mxu0 }
 0x3d9   : > { %v1241_v30 = vsub.f32 %v1239_v28, %v1240_v27 }
 0x3db   : > { %v1242_v31 = vadd.f32 1e-05, %v1241_v30 }
 0x3dd   : > { %1796 = vrsqrt.f32 %v1242_v31 }
 0x3e7   : > { %v1797_v33 = vpop.eup %1796 }
 0x3e8   : > { %v1245_v34 = vmul.f32 %v1797_v33, %v1244_v32 }
 0x3ea   : > { %1690 = vmatmul.mubr.msk.f32.vlgmr.msra.gmra.mrb[2].mxu1 %vm1253_vm8, %v1245_v34  ;;  %v1247_v35 = vmul.f32 %v1245_v34, %v1238_v24 }
 0x3ec   : > { %v1248_v36 = vsub.f32 %v1246_v12, %v1247_v35 }
 0x3ee   : > { %1701 = vmatmul.mubr.msk.f32.vlgmr.msra.gmra.mrb[4].mxu0 %vm1253_vm8, %v1248_v36 }
 0x4bd   : > { %v1323_v40 = vpop.f32.mrb[2].mxu1 }
 0x4be   : > { %v1330_v41 = vrot.slane %v1323_v40, %v1329_v39  ;;  %v1691_v42 = vpop.f32.mrb[3].mxu1 }
 0x4c0   : > { %v1331_v44 = vmul.f32 %v1330_v41, %v1063_v63  ;;  %v1332_v45 = vmul.f32 %v1330_v41, %v1064_v62 }
 0x4c1   : > { %v1402_v43 = vpop.f32.mrb[4].mxu0 }
 0x4c2   : > { %v1409_v46 = vrot.slane %v1402_v43, %v1329_v39  ;;  %v1702_v47 = vpop.f32.mrb[5].mxu0 }
 0x4c4   : > { %v1410_v48 = vadd.f32 %v1409_v46, %v1331_v44  ;;  %v1411_v49 = vadd.f32 %v1409_v46, %v1332_v45 }
 0x4c6   : > { %1412 = vst [vmem:[%s2114_s26] sm:$0xff] %v1410_v48  ;;  %1413 = vst [vmem:[%s2114_s26 + $0x8] sm:$0xff] %v1411_v49 }
 0x4c7 PF: > { %s2115_s30 = sld [smem:[#allocation4_spill]] }
 0x4cd   : > { %s25_s18 = sadd.s32 1, %s2115_s30  }
 0x4ce   : > { %p22_p6 = scmp.ge.s32.totalorder %s25_s18, 5  }
 0x4d0   :  { %24 = sbr.rel (!%p22_p6) target bundleno = 2 (0x2), region = 123 }

</bundles_post_ra>
